<compile_context>
chip_gen: v5e
topology: v5e:2x2
jax: 0.10.0
libtpu: 0.0.40
codegen_flags: <defaults>
</compile_context>

<pallas_src>
import functools

import numpy as np

import jax
import jax.numpy as jnp
from jax.experimental import pallas as pl
from jax.experimental.pallas import tpu as pltpu


# Node rows per grid step.  512 amortizes the ~0.35us per-step overhead
# (measured ~85% of HBM roofline); bump to 1024 for very large meshes.
TILE_N = 512
_LANE = 128

# Shared compiler params: raise v5e's 16 MiB default scoped VMEM; per-kernel
# usage here is ~1-3 MiB so 32 MiB leaves ample headroom on v7x's 64 MiB.
_VMEM_LIMIT = 32 * 1024 * 1024
_CP_PARALLEL = pltpu.CompilerParams(
    dimension_semantics=("parallel",), vmem_limit_bytes=_VMEM_LIMIT)
_CP_ARBITRARY = pltpu.CompilerParams(
    dimension_semantics=("arbitrary",), vmem_limit_bytes=_VMEM_LIMIT)


def _round_up(x, m):
    return (x + m - 1) // m * m


# ----------------------------------------------------------------------------
# Pallas kernels
# ----------------------------------------------------------------------------

def _steer_kernel(*refs, relu_flags, emit_h):
    """[optional fused MLP chain] -> p = h @ Wu_eff (and optionally emit h).

    refs = x, (w, b)*n_pre, wu_eff, [h_out], p_out
    BN of the previous layer is already folded into Wu_eff (the shift term
    cancels in u @ (x_i - x_j)), so no scale/shift prologue is needed.
    """
    n_pre = len(relu_flags)
    x_ref = refs[0]
    wu_ref = refs[1 + 2 * n_pre]
    out_refs = refs[2 + 2 * n_pre:]

    h = x_ref[...]
    for l, relu in enumerate(relu_flags):
        w = refs[1 + 2 * l][...]
        b = refs[2 + 2 * l][...]
        h = jnp.dot(h, w, preferred_element_type=jnp.float32) + b
        if relu:
            h = jnp.maximum(h, 0.0)
    p = jnp.dot(h, wu_ref[...], preferred_element_type=jnp.float32)
    if emit_h:
        out_refs[0][...] = h
        out_refs[1][...] = p
    else:
        out_refs[0][...] = p


def encode_and_steer(x, enc_layers, wu_eff):
    """Encoder MLP fused with the first conv's steering projection."""
    n_pad, cin = x.shape
    assert n_pad % TILE_N == 0
    relu_flags = tuple(bool(r) for _, _, r in enc_layers)
    h_dim = enc_layers[-1][0].shape[1]
    num_heads = wu_eff.shape[1]

    in_specs = [pl.BlockSpec((TILE_N, cin), lambda i: (i, 0))]
    args = [x]
    for (w, b, _) in enc_layers:
        in_specs += [pl.BlockSpec(w.shape, lambda i: (0, 0)),
                     pl.BlockSpec(b.shape, lambda i: (0, 0))]
        args += [w, b]
    in_specs += [pl.BlockSpec(wu_eff.shape, lambda i: (0, 0))]
    args += [wu_eff]

    return pl.pallas_call(
        functools.partial(_steer_kernel, relu_flags=relu_flags, emit_h=True),
        grid=(n_pad // TILE_N,),
        in_specs=in_specs,
        out_specs=(pl.BlockSpec((TILE_N, h_dim), lambda i: (i, 0)),
                   pl.BlockSpec((TILE_N, num_heads), lambda i: (i, 0))),
        out_shape=(jax.ShapeDtypeStruct((n_pad, h_dim), jnp.float32),
                   jax.ShapeDtypeStruct((n_pad, num_heads), jnp.float32)),
        compiler_params=_CP_PARALLEL,
    )(*args)


def steer(h, wu_eff):
    """p = h @ Wu_eff for layers > 0 (BN folded into Wu_eff)."""
    n_pad, cin = h.shape
    assert n_pad % TILE_N == 0
    num_heads = wu_eff.shape[1]
    return pl.pallas_call(
        functools.partial(_steer_kernel, relu_flags=(), emit_h=False),
        grid=(n_pad // TILE_N,),
        in_specs=[pl.BlockSpec((TILE_N, cin), lambda i: (i, 0)),
                  pl.BlockSpec(wu_eff.shape, lambda i: (0, 0))],
        out_specs=pl.BlockSpec((TILE_N, num_heads), lambda i: (i, 0)),
        out_shape=jax.ShapeDtypeStruct((n_pad, num_heads), jnp.float32),
        compiler_params=_CP_PARALLEL,
    )(h, wu_eff)


def _attend_kernel(*refs, max_deg, num_heads, cin, relu, post_relu_flags):
    """Batched softmax attention + MXU head/slot reduction + output transform
    (+ optional fused decoder MLP).

    refs = p, pj, hj, slot_w, c, wz_eff, wshift, bias, (w, b)*n_post, o_out
    """
    p_ref, pj_ref, hj_ref, sw_ref, c_ref, wz_ref, wsh_ref, bias_ref = refs[:8]
    o_ref = refs[-1]
    H, D = num_heads, max_deg
    f32 = jnp.float32

    def ind(rows, cols, fn):
        # Tiny constant 0/1 indicator matrices, built on the VPU each step
        # (a handful of vregs -- negligible), consumed by the MXU.
        r = jax.lax.broadcasted_iota(jnp.int32, (rows, cols), 0)
        c = jax.lax.broadcasted_iota(jnp.int32, (rows, cols), 1)
        return fn(r, c).astype(f32)

    tile_h = ind(H, D * H, lambda r, c: (c % H) == r)         # p_i+c -> all slots
    expand_d = ind(D, D * H, lambda r, c: (c // H) == r)      # per-slot scalar -> H lanes
    sum_h = ind(D * H, D, lambda r, c: (r // H) == c)         # sum heads within slot
    sum_d = ind(D * H, H, lambda r, c: (r % H) == c)          # sum slots per head
    expand_hc = ind(H, H * cin, lambda r, c: (c // cin) == r)  # head weight -> cin lanes
    tile_c = ind(cin, H * cin, lambda r, c: (c % cin) == r)    # tile h_j over heads

    p_i = p_ref[...]                                   # [TM, H]
    c_vec = c_ref[...]                                 # [1, H]
    pj = pj_ref[...]                                   # [TM, D*H]

    # --- softmax over heads, batched over all neighbour slots ----------------
    logits = jnp.dot(p_i + c_vec, tile_h,
                     preferred_element_type=f32) - pj          # u(x_i-x_j)+c
    m_all = jnp.concatenate(
        [jnp.max(logits[:, d * H:(d + 1) * H], axis=-1, keepdims=True)
         for d in range(D)], axis=1)                           # exact per-slot max
    e = jnp.exp(logits - jnp.dot(m_all, expand_d, preferred_element_type=f32))
    denom = jnp.dot(e, sum_h, preferred_element_type=f32)      # [TM, D]
    w_rec = sw_ref[...] * pl.reciprocal(denom, approx=True)    # mask/deg folded in
    a_all = e * jnp.dot(w_rec, expand_d, preferred_element_type=f32)

    # --- per-slot messages, head reduction + transform on the MXU ------------
    out_ch = wz_ref.shape[1]
    wz = wz_ref[...]                                   # [H*cin, out_ch] (BN-scaled)
    acc = jnp.zeros((p_i.shape[0], out_ch), f32)
    for d in range(D):
        a_d = a_all[:, d * H:(d + 1) * H]                              # [TM, H]
        h_d = hj_ref[:, d * cin:(d + 1) * cin]                         # [TM, cin]
        msg = (jnp.dot(a_d, expand_hc, preferred_element_type=f32) *
               jnp.dot(h_d, tile_c, preferred_element_type=f32))       # [TM, H*cin]
        acc = acc + jnp.dot(msg, wz, preferred_element_type=f32)
    s = jnp.dot(a_all, sum_d, preferred_element_type=f32)              # [TM, H]
    out = acc + jnp.dot(s, wsh_ref[...], preferred_element_type=f32) \
        + bias_ref[...]                                                # BN shift term + bias
    if relu:
        out = jnp.maximum(out, 0.0)
    for l, rf in enumerate(post_relu_flags):                           # fused decoder MLP
        w = refs[8 + 2 * l][...]
        b = refs[9 + 2 * l][...]
        out = jnp.dot(out, w, preferred_element_type=f32) + b
        if rf:
            out = jnp.maximum(out, 0.0)
    o_ref[...] = out


def feast_attend_aggregate(p, pj, hj, slot_w, c, wz_eff, wshift, bias, *,
                           num_heads, cin, max_deg, relu, post_layers=()):
    n_pad = p.shape[0]
    assert n_pad % TILE_N == 0
    post_layers = list(post_layers)
    post_relu_flags = tuple(bool(r) for _, _, r in post_layers)
    out_ch = wz_eff.shape[1]

    in_specs = [
        pl.BlockSpec((TILE_N, num_heads), lambda i: (i, 0)),
        pl.BlockSpec((TILE_N, max_deg * num_heads), lambda i: (i, 0)),
        pl.BlockSpec((TILE_N, max_deg * cin), lambda i: (i, 0)),
        pl.BlockSpec((TILE_N, max_deg), lambda i: (i, 0)),
        pl.BlockSpec(c.shape, lambda i: (0, 0)),
        pl.BlockSpec(wz_eff.shape, lambda i: (0, 0)),
        pl.BlockSpec(wshift.shape, lambda i: (0, 0)),
        pl.BlockSpec(bias.shape, lambda i: (0, 0)),
    ]
    args = [p, pj, hj, slot_w, c, wz_eff, wshift, bias]
    for (w, b, _) in post_layers:
        in_specs += [pl.BlockSpec(w.shape, lambda i: (0, 0)),
                     pl.BlockSpec(b.shape, lambda i: (0, 0))]
        args += [w, b]
    final_c = post_layers[-1][0].shape[1] if post_layers else out_ch

    return pl.pallas_call(
        functools.partial(_attend_kernel, max_deg=max_deg, num_heads=num_heads,
                          cin=cin, relu=relu, post_relu_flags=post_relu_flags),
        grid=(n_pad // TILE_N,),
        in_specs=in_specs,
        out_specs=pl.BlockSpec((TILE_N, final_c), lambda i: (i, 0)),
        out_shape=jax.ShapeDtypeStruct((n_pad, final_c), jnp.float32),
        compiler_params=_CP_PARALLEL,
    )(*args)


def _bn_stats_kernel(x_ref, m_ref, s_ref, ss_ref):
    """Accumulate masked per-channel sum and sum-of-squares across node tiles."""
    @pl.when(pl.program_id(0) == 0)
    def _():
        s_ref[...] = jnp.zeros_like(s_ref)
        ss_ref[...] = jnp.zeros_like(ss_ref)

    xm = x_ref[...] * m_ref[...]
    s_ref[...] += jnp.sum(xm, axis=0, keepdims=True)
    ss_ref[...] += jnp.sum(xm * x_ref[...], axis=0, keepdims=True)


def bn_batch_stats(x, row_mask):
    n_pad, c = x.shape
    assert n_pad % TILE_N == 0
    return pl.pallas_call(
        _bn_stats_kernel,
        grid=(n_pad // TILE_N,),
        in_specs=[pl.BlockSpec((TILE_N, c), lambda i: (i, 0)),
                  pl.BlockSpec((TILE_N, 1), lambda i: (i, 0))],
        out_specs=(pl.BlockSpec((1, c), lambda i: (0, 0)),
                   pl.BlockSpec((1, c), lambda i: (0, 0))),
        out_shape=(jax.ShapeDtypeStruct((1, c), jnp.float32),
                   jax.ShapeDtypeStruct((1, c), jnp.float32)),
        compiler_params=_CP_ARBITRARY,
    )(x, row_mask)


def bn_scale_shift(x, row_mask, n_valid, gamma, beta, eps=1e-5):
    """Fold train-mode BatchNorm1d (biased var) into per-channel scale/shift.
    The scale/shift are then folded host-side into the *next* conv's weights,
    so no kernel ever applies them explicitly.  Final [1, C] math is tiny JAX
    glue."""
    s, ss = bn_batch_stats(x, row_mask)
    mean = s / n_valid
    var = jnp.maximum(ss / n_valid - mean * mean, 0.0)
    rstd = jax.lax.rsqrt(var + eps)
    scale = gamma * rstd
    shift = beta - mean * scale
    return scale, shift


# ----------------------------------------------------------------------------
# Graph preprocessing (host-side index glue, done once per graph)
# ----------------------------------------------------------------------------

def build_graph(edge_index, num_nodes, tile_n=TILE_N):
    """remove_self_loops + add_self_loops, then build a padded neighbour list
    (incoming edges per target node), slot weights (mask/deg) and row mask."""
    src = np.asarray(edge_index[0])
    dst = np.asarray(edge_index[1])
    keep = src != dst
    src, dst = src[keep], dst[keep]
    loops = np.arange(num_nodes, dtype=src.dtype)
    src = np.concatenate([src, loops])
    dst = np.concatenate([dst, loops])

    deg = np.bincount(dst, minlength=num_nodes).astype(np.int64)
    max_deg = int(deg.max())
    n_pad = _round_up(num_nodes, tile_n)

    nbr = np.zeros((n_pad, max_deg), np.int32)
    msk = np.zeros((n_pad, max_deg), np.float32)
    fill = np.zeros(num_nodes, np.int64)
    for s, d in zip(src.tolist(), dst.tolist()):
        nbr[d, fill[d]] = s
        msk[d, fill[d]] = 1.0
        fill[d] += 1

    inv_deg = np.ones((n_pad, 1), np.float32)
    inv_deg[:num_nodes, 0] = 1.0 / np.maximum(deg, 1)
    row_mask = np.zeros((n_pad, 1), np.float32)
    row_mask[:num_nodes, 0] = 1.0
    slot_w = msk * inv_deg                      # mask and 1/deg pre-multiplied

    return dict(nbr=jnp.asarray(nbr), mask=jnp.asarray(msk),
                inv_deg=jnp.asarray(inv_deg), slot_w=jnp.asarray(slot_w),
                row_mask=jnp.asarray(row_mask),
                num_nodes=int(num_nodes), max_deg=max_deg)


# ----------------------------------------------------------------------------
# Parameter construction (deterministic, mirrors the PyTorch __init__)
# ----------------------------------------------------------------------------

def _torch_linear_init(key, fan_in, fan_out):
    kw, kb = jax.random.split(key)
    bound = 1.0 / jnp.sqrt(jnp.float32(fan_in))
    w = jax.random.uniform(kw, (fan_in, fan_out), jnp.float32, -bound, bound)
    b = jax.random.uniform(kb, (1, fan_out), jnp.float32, -bound, bound)
    return w, b


def _mlp_params(key, channels):
    layers = []
    pairs = list(zip(channels[:-1], channels[1:]))
    keys = jax.random.split(key, len(pairs))
    for idx, ((cin, cout), k) in enumerate(zip(pairs, keys)):
        w, b = _torch_linear_init(k, cin, cout)
        relu = idx < len(pairs) - 1          # final layer uses Identity
        layers.append((w, b, relu))
    return layers


def _feast_params(key, in_ch, out_ch, num_heads):
    k1, k2, k3, k4 = jax.random.split(key, 4)
    wlin = jax.random.uniform(k1, (in_ch, out_ch * num_heads), jnp.float32)
    wu = jax.random.uniform(k2, (in_ch, num_heads), jnp.float32)
    c = 0.1 * jax.random.normal(k3, (1, num_heads), jnp.float32)
    bias = 0.1 * jax.random.normal(k4, (1, out_ch), jnp.float32)
    return dict(wlin=wlin, wu=wu, c=c, bias=bias,
                num_heads=num_heads, out_ch=out_ch)


def build_mesh_seg_params(key, in_features, encoder_channels, conv_channels,
                          decoder_channels, num_classes, num_heads):
    k_enc, k_gnn, k_dec = jax.random.split(key, 3)
    params = {"num_classes": num_classes}
    params["encoder"] = _mlp_params(k_enc, [in_features] + encoder_channels)

    gnn_channels = [encoder_channels[-1]] + conv_channels
    conv_keys = jax.random.split(k_gnn, len(gnn_channels) - 1)
    params["convs"] = [
        _feast_params(ck, cin, cout, num_heads)
        for ck, (cin, cout) in zip(conv_keys,
                                   zip(gnn_channels[:-1], gnn_channels[1:]))
    ]
    params["bns"] = [
        (jnp.ones((1, ch), jnp.float32), jnp.zeros((1, ch), jnp.float32))
        for ch in conv_channels[:-1]
    ]
    params["decoder"] = _mlp_params(
        k_dec, [conv_channels[-1]] + decoder_channels + [num_classes])
    return params


def _pad_last_layer_to_lanes(layers, lanes=_LANE):
    """Pad the final linear layer to a lane-dense (multiple of 128) width."""
    *rest, (w, b, relu) = layers
    pad = (-w.shape[1]) % lanes
    if pad == 0:
        return list(layers)
    return list(rest) + [(jnp.pad(w, ((0, 0), (0, pad))),
                          jnp.pad(b, ((0, 0), (0, pad))), relu)]


# ----------------------------------------------------------------------------
# Forward pass
# ----------------------------------------------------------------------------

def mesh_seg_forward(params, x, graph):
    n = graph["num_nodes"]
    n_pad, max_deg = graph["nbr"].shape
    num_classes = params["num_classes"]
    x = jnp.pad(x.astype(jnp.float32), ((0, n_pad - n), (0, 0)))

    convs, bns = params["convs"], params["bns"]
    decoder_padded = _pad_last_layer_to_lanes(params["decoder"])
    nbr, slot_w, row_mask = graph["nbr"], graph["slot_w"], graph["row_mask"]

    h = x
    scale = shift = None
    for l, cp in enumerate(convs):
        is_last = l == len(convs) - 1
        H, O = cp["num_heads"], cp["out_ch"]
        cin = cp["wu"].shape[0]

        # Fold the previous layer's BatchNorm (scale/shift) into this layer's
        # weights (tiny host-side glue): shift cancels in u(x_i - x_j).
        if l == 0:
            scale_v = jnp.ones((cin,), jnp.float32)
            shift_v = jnp.zeros((cin,), jnp.float32)
        else:
            scale_v = scale.reshape(-1)
            shift_v = shift.reshape(-1)
        wu_eff = scale_v[:, None] * cp["wu"]                      # [cin, H]
        wst = cp["wlin"].reshape(cin, H, O).transpose(1, 0, 2).reshape(H * cin, O)
        wz_eff = jnp.tile(scale_v, H)[:, None] * wst              # [H*cin, O]
        wshift = jnp.einsum('c,hco->ho', shift_v, wst.reshape(H, cin, O))

        # node-space steering p = BN(h) @ Wu (encoder MLP fused for layer 0)
        if l == 0:
            h, p = encode_and_steer(x, params["encoder"], wu_eff)
        else:
            p = steer(h, wu_eff)

        # neighbour gathers of the *narrow* node tensors (index glue).
        # TODO(synk): move in-kernel (scalar-prefetched indices + DMA gather /
        # VMEM-resident table) to avoid this HBM round-trip at very large N.
        pj = p[nbr].reshape(n_pad, max_deg * H)
        hj = h[nbr].reshape(n_pad, max_deg * cin)

        h = feast_attend_aggregate(
            p, pj, hj, slot_w, cp["c"], wz_eff, wshift, cp["bias"],
            num_heads=H, cin=cin, max_deg=max_deg,
            relu=not is_last,
            post_layers=decoder_padded if is_last else ())

        if not is_last:
            gamma, beta = bns[l]
            scale, shift = bn_scale_shift(h, row_mask, float(n), gamma, beta)

    return h[:n, :num_classes]


# ----------------------------------------------------------------------------
# Pure-JAX reference (same math, unpadded) for a correctness sanity check
# ----------------------------------------------------------------------------

def reference_forward(params, x, graph):
    n = graph["num_nodes"]
    nbr = graph["nbr"][:n]
    msk = graph["mask"][:n]
    inv_deg = graph["inv_deg"][:n]
    hp = jax.lax.Precision.HIGHEST

    h = x
    for w, b, r in params["encoder"]:
        h = jnp.dot(h, w, precision=hp) + b
        if r:
            h = jnp.maximum(h, 0.0)

    convs, bns = params["convs"], params["bns"]
    for l, cp in enumerate(convs):
        H, O = cp["num_heads"], cp["out_ch"]
        p = jnp.dot(h, cp["wu"], precision=hp)
        y = jnp.dot(h, cp["wlin"], precision=hp)
        p_j = p[nbr]                                     # [n, D, H]
        y_j = y[nbr].reshape(n, -1, H, O)                # [n, D, H, O]
        logits = p[:, None, :] - p_j + cp["c"].reshape(1, 1, H)
        attn = jax.nn.softmax(logits, axis=-1)
        msg = jnp.sum(attn[..., None] * y_j, axis=2)     # [n, D, O]
        agg = jnp.sum(msg * msk[..., None], axis=1) * inv_deg
        h = agg + cp["bias"]
        if l < len(convs) - 1:
            h = jnp.maximum(h, 0.0)
            gamma, beta = bns[l]
            mean = jnp.mean(h, axis=0, keepdims=True)
            var = jnp.mean((h - mean) ** 2, axis=0, keepdims=True)
            h = gamma * (h - mean) * jax.lax.rsqrt(var + 1e-5) + beta

    for w, b, r in params["decoder"]:
        h = jnp.dot(h, w, precision=hp) + b
        if r:
            h = jnp.maximum(h, 0.0)
    return h


# ----------------------------------------------------------------------------
# Example run
# ----------------------------------------------------------------------------

if __name__ == "__main__":
    key = jax.random.PRNGKey(0)
    k_x, k_p = jax.random.split(key)

    # small ring mesh: bidirectional +-1 and +-2 edges (self loops added
    # internally) -> deg 5; 600 nodes > TILE_N so the node-tiled grid and
    # padding are exercised (n_pad = 1024, two 512-row tiles).
    num_nodes = 600
    in_features = 8
    encoder_channels = [16, 32]
    conv_channels = [32, 32, 16]
    decoder_channels = [32]
    num_classes = 5
    num_heads = 4

    x = jax.random.normal(k_x, (num_nodes, in_features), jnp.float32)
    idx = jnp.arange(num_nodes, dtype=jnp.int32)
    src = jnp.concatenate([idx, idx,
                           (idx + 1) % num_nodes, (idx + 2) % num_nodes])
    dst = jnp.concatenate([(idx + 1) % num_nodes, (idx + 2) % num_nodes,
                           idx, idx])
    edge_index = jnp.stack([src, dst])               # [2, E] with E = 2400

    params = build_mesh_seg_params(
        k_p, in_features, encoder_channels, conv_channels,
        decoder_channels, num_classes, num_heads)
    graph = build_graph(edge_index, num_nodes)

    out = mesh_seg_forward(params, x, graph)         # [num_nodes, num_classes]
    jax.block_until_ready(out)
    assert out.shape == (num_nodes, num_classes)
    assert bool(jnp.all(jnp.isfinite(out)))

    ref = reference_forward(params, x, graph)
    max_ref = float(jnp.max(jnp.abs(ref)))
    err = float(jnp.max(jnp.abs(out - ref))) / (1.0 + max_ref)
    assert err < 0.05, f"kernel/reference mismatch: {err}"

    print("KERNEL_OK")
</pallas_src>

<mosaic_0001>
module attributes {stable_mosaic.version = 11 : i64} {
  func.func @_steer_kernel(%arg0: i32, %arg1: memref<512x8xf32, #tpu.memory_space<vmem>>, %arg2: memref<8x16xf32, #tpu.memory_space<vmem>>, %arg3: memref<1x16xf32, #tpu.memory_space<vmem>>, %arg4: memref<16x32xf32, #tpu.memory_space<vmem>>, %arg5: memref<1x32xf32, #tpu.memory_space<vmem>>, %arg6: memref<32x4xf32, #tpu.memory_space<vmem>>, %arg7: memref<512x32xf32, #tpu.memory_space<vmem>>, %arg8: memref<512x4xf32, #tpu.memory_space<vmem>>) attributes {dimension_semantics = [#tpu.dimension_semantics<parallel>], iteration_bounds = array<i64: 2>, scalar_prefetch = 0 : i64, scratch_operands = 0 : i64, tpu.core_type = #tpu.core_type<tc>, window_params = [{transform_indices = @transform_0, window_bounds = array<i64: 512, 8>}, {pipeline_mode = #tpu.pipeline_mode<synchronous>, transform_indices = @transform_1, window_bounds = array<i64: 8, 16>}, {pipeline_mode = #tpu.pipeline_mode<synchronous>, transform_indices = @transform_2, window_bounds = array<i64: 1, 16>}, {pipeline_mode = #tpu.pipeline_mode<synchronous>, transform_indices = @transform_3, window_bounds = array<i64: 16, 32>}, {pipeline_mode = #tpu.pipeline_mode<synchronous>, transform_indices = @transform_4, window_bounds = array<i64: 1, 32>}, {pipeline_mode = #tpu.pipeline_mode<synchronous>, transform_indices = @transform_5, window_bounds = array<i64: 32, 4>}, {transform_indices = @transform_6, window_bounds = array<i64: 512, 32>}, {transform_indices = @transform_7, window_bounds = array<i64: 512, 4>}]} {
    %c0 = arith.constant 0 : index
    %c0_0 = arith.constant 0 : index
    %0 = vector.load %arg1[%c0, %c0_0] : memref<512x8xf32, #tpu.memory_space<vmem>>, vector<512x8xf32>
    %c0_1 = arith.constant 0 : index
    %c0_2 = arith.constant 0 : index
    %1 = vector.load %arg2[%c0_1, %c0_2] : memref<8x16xf32, #tpu.memory_space<vmem>>, vector<8x16xf32>
    %c0_3 = arith.constant 0 : index
    %c0_4 = arith.constant 0 : index
    %2 = vector.load %arg3[%c0_3, %c0_4] : memref<1x16xf32, #tpu.memory_space<vmem>>, vector<1x16xf32>
    %cst = arith.constant dense<0.000000e+00> : vector<512x16xf32>
    %3 = tpu.matmul %0, %1, %cst {dimension_numbers = #tpu.dot_dimension_numbers<[1], [0], [0], [1], [0, 0, 1, 1], [], []>} : vector<512x8xf32>, vector<8x16xf32>, vector<512x16xf32> -> vector<512x16xf32>
    %4 = vector.broadcast %2 : vector<1x16xf32> to vector<512x16xf32>
    %5 = arith.addf %3, %4 : vector<512x16xf32>
    %cst_5 = arith.constant 0.000000e+00 : f32
    %6 = vector.broadcast %cst_5 : f32 to vector<512x16xf32>
    %7 = arith.maximumf %5, %6 : vector<512x16xf32>
    %c0_6 = arith.constant 0 : index
    %c0_7 = arith.constant 0 : index
    %8 = vector.load %arg4[%c0_6, %c0_7] : memref<16x32xf32, #tpu.memory_space<vmem>>, vector<16x32xf32>
    %c0_8 = arith.constant 0 : index
    %c0_9 = arith.constant 0 : index
    %9 = vector.load %arg5[%c0_8, %c0_9] : memref<1x32xf32, #tpu.memory_space<vmem>>, vector<1x32xf32>
    %cst_10 = arith.constant dense<0.000000e+00> : vector<512x32xf32>
    %10 = tpu.matmul %7, %8, %cst_10 {dimension_numbers = #tpu.dot_dimension_numbers<[1], [0], [0], [1], [0, 0, 1, 1], [], []>} : vector<512x16xf32>, vector<16x32xf32>, vector<512x32xf32> -> vector<512x32xf32>
    %11 = vector.broadcast %9 : vector<1x32xf32> to vector<512x32xf32>
    %12 = arith.addf %10, %11 : vector<512x32xf32>
    %c0_11 = arith.constant 0 : index
    %c0_12 = arith.constant 0 : index
    %13 = vector.load %arg6[%c0_11, %c0_12] : memref<32x4xf32, #tpu.memory_space<vmem>>, vector<32x4xf32>
    %cst_13 = arith.constant dense<0.000000e+00> : vector<512x4xf32>
    %14 = tpu.matmul %12, %13, %cst_13 {dimension_numbers = #tpu.dot_dimension_numbers<[1], [0], [0], [1], [0, 0, 1, 1], [], []>} : vector<512x32xf32>, vector<32x4xf32>, vector<512x4xf32> -> vector<512x4xf32>
    %c0_14 = arith.constant 0 : index
    %c0_15 = arith.constant 0 : index
    %15 = vector.load %arg7[%c0_14, %c0_15] : memref<512x32xf32, #tpu.memory_space<vmem>>, vector<512x32xf32>
    tpu.vector_store %arg7[%c0_14, %c0_15], %12 {strides = array<i32>} : memref<512x32xf32, #tpu.memory_space<vmem>>, vector<512x32xf32>,
    %c0_16 = arith.constant 0 : index
    %c0_17 = arith.constant 0 : index
    %16 = vector.load %arg8[%c0_16, %c0_17] : memref<512x4xf32, #tpu.memory_space<vmem>>, vector<512x4xf32>
    tpu.vector_store %arg8[%c0_16, %c0_17], %14 {strides = array<i32>} : memref<512x4xf32, #tpu.memory_space<vmem>>, vector<512x4xf32>,
    return
  }
  func.func @transform_0(%arg0: i32) -> (i32, i32) {
    %c0_i32 = arith.constant 0 : i32
    %c0_i32_0 = arith.constant 0 : i32
    return %arg0, %c0_i32 : i32, i32
  }
  func.func @transform_1(%arg0: i32) -> (i32, i32) {
    %c0_i32 = arith.constant 0 : i32
    %c0_i32_0 = arith.constant 0 : i32
    %c0_i32_1 = arith.constant 0 : i32
    return %c0_i32, %c0_i32_0 : i32, i32
  }
  func.func @transform_2(%arg0: i32) -> (i32, i32) {
    %c0_i32 = arith.constant 0 : i32
    %c0_i32_0 = arith.constant 0 : i32
    %c0_i32_1 = arith.constant 0 : i32
    return %c0_i32, %c0_i32_0 : i32, i32
  }
  func.func @transform_3(%arg0: i32) -> (i32, i32) {
    %c0_i32 = arith.constant 0 : i32
    %c0_i32_0 = arith.constant 0 : i32
    %c0_i32_1 = arith.constant 0 : i32
    return %c0_i32, %c0_i32_0 : i32, i32
  }
  func.func @transform_4(%arg0: i32) -> (i32, i32) {
    %c0_i32 = arith.constant 0 : i32
    %c0_i32_0 = arith.constant 0 : i32
    %c0_i32_1 = arith.constant 0 : i32
    return %c0_i32, %c0_i32_0 : i32, i32
  }
  func.func @transform_5(%arg0: i32) -> (i32, i32) {
    %c0_i32 = arith.constant 0 : i32
    %c0_i32_0 = arith.constant 0 : i32
    %c0_i32_1 = arith.constant 0 : i32
    return %c0_i32, %c0_i32_0 : i32, i32
  }
  func.func @transform_6(%arg0: i32) -> (i32, i32) {
    %c0_i32 = arith.constant 0 : i32
    %c0_i32_0 = arith.constant 0 : i32
    return %arg0, %c0_i32 : i32, i32
  }
  func.func @transform_7(%arg0: i32) -> (i32, i32) {
    %c0_i32 = arith.constant 0 : i32
    %c0_i32_0 = arith.constant 0 : i32
    return %arg0, %c0_i32 : i32, i32
  }
}

</mosaic_0001>

<bundles_post_ra>
// kernel: tpu_custom_call.1
= control target key start
LH: loop header
LB: loop body
LE: loop exit
PB: predicated region body
PF: predicated region fallthrough
CT: control target
= control target key end

     0   :  { %s2136_s24 = smov 0   ;;  %s2864_s0 = inlined_call_operand.vmem [shape: f32[1024,8], index: 0, kind: input, shape index: {}]   ;;  %s2865_s1 = inlined_call_operand.vmem [shape: f32[8,16], index: 1, kind: input, shape index: {}]   ;;  %s2866_s2 = inlined_call_operand.vmem [shape: f32[1,16], index: 2, kind: input, shape index: {}]   ;;  %s2867_s3 = inlined_call_operand.vmem [shape: f32[16,32], index: 3, kind: input, shape index: {}]   ;;  %s2868_s4 = inlined_call_operand.vmem [shape: f32[1,32], index: 4, kind: input, shape index: {}]   ;;  %s2869_s5 = inlined_call_operand.vmem [shape: f32[32,4], index: 5, kind: input, shape index: {}]   ;;  %s2870_s6 = inlined_call_operand.vmem [shape: f32[1024,32], index: 6, kind: output, shape index: {0}]   ;;  %s2871_s7 = inlined_call_operand.vmem [shape: f32[1024,4], index: 7, kind: output, shape index: {1}]  }
   0x1 LB: > { %s1864_s25 = sadd.s32 4294967295, %s2094_s24   ;;  %p1868_p0 = scmp.ge.s32.totalorder %s2094_s24, 1  ;;  %s2094_s24 = sphi %s2136_s24, %s18_s24  }
   0x2   : > { %p241_p1 = scmp.lt.s32.totalorder %s2094_s24, 3 }
   0x4   : > { %p242_p2 = pnand %p1868_p0, %p241_p1 }
   0x5   : > { %s1869_s28 = sshll.u32 (!%p242_p2), %s1864_s25, 6 }
   0x6   : > { %245 = sbr.rel (%p242_p2) target bundleno = 916 (0x394), region = 44  ;;  %p279_p3 = scmp.lt.s32.totalorder (!%p242_p2), %s1869_s28, 127 }
   0xb   : > { %v360_v0 = vld [vmem:[%s2865_s1] sm:$0xff]  ;;  %s2873_s28 = smov (!%p279_p3, %s1869_s28), 127  ;;  %vm365_vm0 = vcmask 64512   ;;  %v832_v14 = vld [vmem:[%s2867_s3 + $0x8] sm:$0xff]  ;;  %vm837_vm1 = vcmask 130048   ;;  %vm1243_vm2 = vcmask 261120  }
   0xc   : > { %573 = vmatpush.msra.mxu0 %v360_v0  ;;  %2069 = vmatpush.msra.mxu3 %v360_v0  ;;  %s2147_s29 = sshll.u32 %s2873_s28, 3  ;;  %v831_v15 = vld [vmem:[%s2867_s3] sm:$0xff]  ;;  %vm1709_vm3 = vcmask 31744  }
   0xd   : > { %s2153_s9 = scalar_lea.vmem %s2864_s0, %s2147_s29  ;;  %1044 = vmatpush.msra.mxu1 %v832_v14  ;;  %v2196_v19 = vld [vmem:[%s2866_s2] ss:$0 sm:$0xff]  ;;  %s2297_s30 = scalar_lea.vmem %s2870_s6, %s2147_s29 }
   0xe   : > { %v296_v1 = vld [vmem:[%s2153_s9] sm:$0xff]  ;;  %v297_v2 = vld [vmem:[%s2153_s9 + $0x8] sm:$0xff]  ;;  %v298_v3 = vld [vmem:[%s2153_s9 + $0x10] sm:$0xff]  ;;  %2070 = vmatpush.msrb.mxu3 %v832_v14  ;;  %s2450_s11 = scalar_lea.vmem %s2871_s7, %s2147_s29 }
   0xf   : > { %1875 = vmatmul.msk.f32.vlgmr.msra.gmra.mxu0 %vm365_vm0, %v296_v1  ;;  %v299_v4 = vld [vmem:[%s2153_s9 + $0x18] sm:$0xff]  ;;  %v300_v5 = vld [vmem:[%s2153_s9 + $0x20] sm:$0xff]  ;;  %v301_v6 = vld [vmem:[%s2153_s9 + $0x28] sm:$0xff]  ;;  %1045 = vmatpush.msra.mxu1 %v831_v15 }
  0x10   : > { %v302_v7 = vld [vmem:[%s2153_s9 + $0x30] sm:$0xff]  ;;  %v303_v8 = vld [vmem:[%s2153_s9 + $0x38] sm:$0xff]  ;;  %v304_v9 = vld [vmem:[%s2153_s9 + $0x40] sm:$0xff]  ;;  %2071 = vmatpush.msrb.mxu3 %v831_v15 }
  0x11   : > { %v305_v10 = vld [vmem:[%s2153_s9 + $0x48] sm:$0xff]  ;;  %v306_v11 = vld [vmem:[%s2153_s9 + $0x50] sm:$0xff]  ;;  %v307_v12 = vld [vmem:[%s2153_s9 + $0x58] sm:$0xff] }
  0x12   : > { %v308_v13 = vld [vmem:[%s2153_s9 + $0x60] sm:$0xff]  ;;  %v309_v16 = vld [vmem:[%s2153_s9 + $0x68] sm:$0xff]  ;;  %v310_v17 = vld [vmem:[%s2153_s9 + $0x70] sm:$0xff] }
  0x13   : > { %v311_v18 = vld [vmem:[%s2153_s9 + $0x78] sm:$0xff]  ;;  %v312_v21 = vld [vmem:[%s2153_s9 + $0x80] sm:$0xff]  ;;  %v313_v25 = vld [vmem:[%s2153_s9 + $0x88] sm:$0xff] }
  0x14   : > { %v314_v29 = vld [vmem:[%s2153_s9 + $0x90] sm:$0xff]  ;;  %v315_v33 = vld [vmem:[%s2153_s9 + $0x98] sm:$0xff]  ;;  %v316_v37 = vld [vmem:[%s2153_s9 + $0xa0] sm:$0xff] }
  0x15   : > { %v317_v41 = vld [vmem:[%s2153_s9 + $0xa8] sm:$0xff]  ;;  %v318_v45 = vld [vmem:[%s2153_s9 + $0xb0] sm:$0xff]  ;;  %v319_v49 = vld [vmem:[%s2153_s9 + $0xb8] sm:$0xff] }
  0x16   : > { %v320_v53 = vld [vmem:[%s2153_s9 + $0xc0] sm:$0xff]  ;;  %v321_v57 = vld [vmem:[%s2153_s9 + $0xc8] sm:$0xff]  ;;  %v322_v61 = vld [vmem:[%s2153_s9 + $0xd0] sm:$0xff] }
  0x17   : > { %1876 = vmatmul.msk.f32.gmra.mxu0 %vm365_vm0, %v297_v2  ;;  %v323_v1 = vld [vmem:[%s2153_s9 + $0xd8] sm:$0xff] }
  0x1f   : > { %1877 = vmatmul.msk.f32.gmra.mxu0 %vm365_vm0, %v298_v3 }
  0x27   : > { %1878 = vmatmul.msk.f32.gmra.mxu0 %vm365_vm0, %v299_v4  ;;  %v2249_v4 = vld [vmem:[%s2869_s5 + $0x18] sm:$0xff] }
  0x28   : > { %1448 = vmatpush.msra.mxu2 %v2249_v4 }
  0x2f   : > { %1879 = vmatmul.msk.f32.gmra.mxu0 %vm365_vm0, %v300_v5  ;;  %v2255_v5 = vld [vmem:[%s2869_s5 + $0x10] sm:$0xff] }
  0x30   : > { %1449 = vmatpush.msra.mxu2 %v2255_v5 }
  0x37   : > { %1880 = vmatmul.msk.f32.gmra.mxu0 %vm365_vm0, %v301_v6 }
  0x3f   : > { %1881 = vmatmul.msk.f32.gmra.mxu0 %vm365_vm0, %v302_v7  ;;  %v324_v7 = vld [vmem:[%s2153_s9 + $0xe0] sm:$0xff] }
  0x47   : > { %1882 = vmatmul.msk.f32.gmra.mxu0 %vm365_vm0, %v303_v8 }
  0x4f   : > { %1883 = vmatmul.msk.f32.gmra.mxu0 %vm365_vm0, %v304_v9  ;;  %v2263_v9 = vld [vmem:[%s2869_s5 + $0x8] sm:$0xff] }
  0x50   : > { %1450 = vmatpush.msra.mxu2 %v2263_v9 }
  0x57   : > { %1884 = vmatmul.msk.f32.gmra.mxu0 %vm365_vm0, %v305_v10 }
  0x5f   : > { %1885 = vmatmul.msk.f32.gmra.mxu0 %vm365_vm0, %v306_v11  ;;  %v2270_v11 = vld [vmem:[%s2869_s5] sm:$0xff] }
  0x60   : > { %1451 = vmatpush.msra.mxu2 %v2270_v11 }
  0x67   : > { %1886 = vmatmul.msk.f32.gmra.mxu0 %vm365_vm0, %v307_v12 }
  0x6f   : > { %1887 = vmatmul.msk.f32.gmra.mxu0 %vm365_vm0, %v308_v13  ;;  %v325_v13 = vld [vmem:[%s2153_s9 + $0xe8] sm:$0xff] }
  0x77   : > { %1888 = vmatmul.msk.f32.gmra.mxu0 %vm365_vm0, %v309_v16 }
  0x7f   : > { %1889 = vmatmul.msk.f32.gmra.mxu0 %vm365_vm0, %v310_v17  ;;  %v326_v17 = vld [vmem:[%s2153_s9 + $0xf0] sm:$0xff] }
  0x87   : > { %1890 = vmatmul.msk.f32.gmra.mxu0 %vm365_vm0, %v311_v18 }
  0x8c   : > { %v575_v20 = vpop.f32.mrf.mxu0 }
  0x8d   : > { %v576_v22 = vadd.f32 %v2196_v19, %v575_v20 }
  0x8f   : > { %v767_v23 = vmax.f32 %v576_v22, 0.0  ;;  %1891 = vmatmul.msk.f32.gmra.mxu0 %vm365_vm0, %v312_v21  ;;  %v327_v22 = vld [vmem:[%s2153_s9 + $0xf8] sm:$0xff] }
  0x91   : > { %1939 = vmatmul.msk.f32.vlgmr.msra.gmra.mxu1 %vm837_vm1, %v767_v23 }
  0x94   : > { %v578_v24 = vpop.f32.mrf.mxu0 }
  0x95   : > { %v579_v26 = vadd.f32 %v2196_v19, %v578_v24 }
  0x97   : > { %v768_v27 = vmax.f32 %v579_v26, 0.0  ;;  %1892 = vmatmul.msk.f32.gmra.mxu0 %vm365_vm0, %v313_v25  ;;  %v2289_v25 = vld [vmem:[%s2868_s4] ss:$0 sm:$0xff] }
  0x99   : > { %1940 = vmatmul.msk.f32.gmra.mxu1 %vm837_vm1, %v768_v27  ;;  %v328_v27 = vld [vmem:[%s2153_s9 + $0x100] sm:$0xff] }
  0x9c   : > { %v581_v28 = vpop.f32.mrf.mxu0 }
  0x9d   : > { %v582_v30 = vadd.f32 %v2196_v19, %v581_v28 }
  0x9f   : > { %v769_v31 = vmax.f32 %v582_v30, 0.0  ;;  %1893 = vmatmul.msk.f32.gmra.mxu0 %vm365_vm0, %v314_v29 }
  0xa1   : > { %1941 = vmatmul.msk.f32.gmra.mxu1 %vm837_vm1, %v769_v31 }
  0xa4   : > { %v584_v32 = vpop.f32.mrf.mxu0 }
  0xa5   : > { %v585_v34 = vadd.f32 %v2196_v19, %v584_v32 }
  0xa7   : > { %v770_v35 = vmax.f32 %v585_v34, 0.0  ;;  %1894 = vmatmul.msk.f32.gmra.mxu0 %vm365_vm0, %v315_v33  ;;  %v329_v33 = vld [vmem:[%s2153_s9 + $0x108] sm:$0xff] }
  0xa9   : > { %1942 = vmatmul.msk.f32.gmra.mxu1 %vm837_vm1, %v770_v35 }
  0xac   : > { %v587_v36 = vpop.f32.mrf.mxu0 }
  0xad   : > { %v588_v38 = vadd.f32 %v2196_v19, %v587_v36 }
  0xaf   : > { %v771_v39 = vmax.f32 %v588_v38, 0.0  ;;  %1895 = vmatmul.msk.f32.gmra.mxu0 %vm365_vm0, %v316_v37 }
  0xb1   : > { %1943 = vmatmul.msk.f32.gmra.mxu1 %vm837_vm1, %v771_v39  ;;  %v330_v39 = vld [vmem:[%s2153_s9 + $0x110] sm:$0xff] }
  0xb4   : > { %v590_v40 = vpop.f32.mrf.mxu0 }
  0xb5   : > { %v591_v42 = vadd.f32 %v2196_v19, %v590_v40 }
  0xb7   : > { %v772_v43 = vmax.f32 %v591_v42, 0.0  ;;  %1896 = vmatmul.msk.f32.gmra.mxu0 %vm365_vm0, %v317_v41 }
  0xb9   : > { %1944 = vmatmul.msk.f32.gmra.mxu1 %vm837_vm1, %v772_v43 }
  0xbc   : > { %v593_v44 = vpop.f32.mrf.mxu0 }
  0xbd   : > { %v594_v46 = vadd.f32 %v2196_v19, %v593_v44 }
  0xbf   : > { %v773_v47 = vmax.f32 %v594_v46, 0.0  ;;  %1897 = vmatmul.msk.f32.gmra.mxu0 %vm365_vm0, %v318_v45  ;;  %v331_v45 = vld [vmem:[%s2153_s9 + $0x118] sm:$0xff] }
  0xc1   : > { %1945 = vmatmul.msk.f32.gmra.mxu1 %vm837_vm1, %v773_v47 }
  0xc4   : > { %v596_v48 = vpop.f32.mrf.mxu0 }
  0xc5   : > { %v597_v50 = vadd.f32 %v2196_v19, %v596_v48 }
  0xc7   : > { %v774_v51 = vmax.f32 %v597_v50, 0.0  ;;  %1898 = vmatmul.msk.f32.gmra.mxu0 %vm365_vm0, %v319_v49 }
  0xc9   : > { %1946 = vmatmul.msk.f32.gmra.mxu1 %vm837_vm1, %v774_v51  ;;  %v332_v51 = vld [vmem:[%s2153_s9 + $0x120] sm:$0xff] }
  0xcc   : > { %v599_v52 = vpop.f32.mrf.mxu0 }
  0xcd   : > { %v600_v54 = vadd.f32 %v2196_v19, %v599_v52 }
  0xcf   : > { %v775_v55 = vmax.f32 %v600_v54, 0.0  ;;  %1899 = vmatmul.msk.f32.gmra.mxu0 %vm365_vm0, %v320_v53 }
  0xd1   : > { %1947 = vmatmul.msk.f32.gmra.mxu1 %vm837_vm1, %v775_v55 }
  0xd4   : > { %v602_v56 = vpop.f32.mrf.mxu0 }
  0xd5   : > { %v603_v58 = vadd.f32 %v2196_v19, %v602_v56 }
  0xd7   : > { %v776_v59 = vmax.f32 %v603_v58, 0.0  ;;  %1900 = vmatmul.msk.f32.gmra.mxu0 %vm365_vm0, %v321_v57  ;;  %v333_v57 = vld [vmem:[%s2153_s9 + $0x128] sm:$0xff] }
  0xd9   : > { %1948 = vmatmul.msk.f32.gmra.mxu1 %vm837_vm1, %v776_v59 }
  0xdc   : > { %v605_v60 = vpop.f32.mrf.mxu0 }
  0xdd   : > { %v606_v62 = vadd.f32 %v2196_v19, %v605_v60 }
  0xdf   : > { %v777_v63 = vmax.f32 %v606_v62, 0.0  ;;  %1901 = vmatmul.msk.f32.gmra.mxu0 %vm365_vm0, %v322_v61 }
  0xe1   : > { %1949 = vmatmul.msk.f32.gmra.mxu1 %vm837_vm1, %v777_v63  ;;  %v334_v63 = vld [vmem:[%s2153_s9 + $0x130] sm:$0xff] }
  0xe4   : > { %v608_v0 = vpop.f32.mrf.mxu0 }
  0xe5   : > { %v609_v2 = vadd.f32 %v2196_v19, %v608_v0 }
  0xe7   : > { %v778_v3 = vmax.f32 %v609_v2, 0.0  ;;  %1902 = vmatmul.msk.f32.gmra.mxu0 %vm365_vm0, %v323_v1 }
  0xe9   : > { %1950 = vmatmul.msk.f32.gmra.mxu1 %vm837_vm1, %v778_v3 }
  0xec   : > { %v611_v6 = vpop.f32.mrf.mxu0 }
  0xed   : > { %v612_v8 = vadd.f32 %v2196_v19, %v611_v6 }
  0xef   : > { %v779_v10 = vmax.f32 %v612_v8, 0.0  ;;  %1903 = vmatmul.msk.f32.gmra.mxu0 %vm365_vm0, %v324_v7  ;;  %v335_v7 = vld [vmem:[%s2153_s9 + $0x138] sm:$0xff] }
  0xf1   : > { %1951 = vmatmul.msk.f32.gmra.mxu1 %vm837_vm1, %v779_v10 }
  0xf4   : > { %v614_v12 = vpop.f32.mrf.mxu0 }
  0xf5   : > { %v615_v14 = vadd.f32 %v2196_v19, %v614_v12 }
  0xf7   : > { %v780_v15 = vmax.f32 %v615_v14, 0.0  ;;  %1904 = vmatmul.msk.f32.gmra.mxu0 %vm365_vm0, %v325_v13 }
  0xf9   : > { %1952 = vmatmul.msk.f32.gmra.mxu1 %vm837_vm1, %v780_v15  ;;  %v336_v15 = vld [vmem:[%s2153_s9 + $0x140] sm:$0xff] }
  0xfc   : > { %v617_v16 = vpop.f32.mrf.mxu0 }
  0xfd   : > { %v618_v18 = vadd.f32 %v2196_v19, %v617_v16 }
  0xff   : > { %v781_v20 = vmax.f32 %v618_v18, 0.0  ;;  %1905 = vmatmul.msk.f32.gmra.mxu0 %vm365_vm0, %v326_v17 }
 0x101   : > { %1953 = vmatmul.msk.f32.gmra.mxu1 %vm837_vm1, %v781_v20 }
 0x104   : > { %v620_v21 = vpop.f32.mrf.mxu0 }
 0x105   : > { %v621_v23 = vadd.f32 %v2196_v19, %v620_v21 }
 0x107   : > { %v782_v24 = vmax.f32 %v621_v23, 0.0  ;;  %1906 = vmatmul.msk.f32.gmra.mxu0 %vm365_vm0, %v327_v22  ;;  %v337_v22 = vld [vmem:[%s2153_s9 + $0x148] sm:$0xff] }
 0x109   : > { %1954 = vmatmul.msk.f32.gmra.mxu1 %vm837_vm1, %v782_v24 }
 0x10c   : > { %v623_v26 = vpop.f32.mrf.mxu0 }
 0x10d   : > { %v624_v28 = vadd.f32 %v2196_v19, %v623_v26 }
 0x10e   : > { %v1047_v29 = vpop.f32.mrf.mxu1 }
 0x10f   : > { %v783_v30 = vmax.f32 %v624_v28, 0.0  ;;  %v1048_v31 = vadd.f32 %v2289_v25, %v1047_v29  ;;  %1907 = vmatmul.msk.f32.gmra.mxu0 %vm365_vm0, %v328_v27  ;;  %v338_v29 = vld [vmem:[%s2153_s9 + $0x150] sm:$0xff] }
 0x111   : > { %1645 = vst.msk [vmem:[%s2297_s30] sm:$0xff] %vm1243_vm2, %v1048_v31  ;;  %1955 = vmatmul.msk.f32.gmra.mxu1 %vm837_vm1, %v783_v30  ;;  %2003 = vmatmul.msk.f32.vlgmr.msra.gmra.mxu2 %vm1243_vm2, %v1048_v31 }
 0x114   : > { %v626_v32 = vpop.f32.mrf.mxu0 }
 0x115   : > { %v627_v34 = vadd.f32 %v2196_v19, %v626_v32 }
 0x116   : > { %v1050_v35 = vpop.f32.mrf.mxu1 }
 0x117   : > { %v784_v36 = vmax.f32 %v627_v34, 0.0  ;;  %v1051_v37 = vadd.f32 %v2289_v25, %v1050_v35  ;;  %1908 = vmatmul.msk.f32.gmra.mxu0 %vm365_vm0, %v329_v33  ;;  %v339_v35 = vld [vmem:[%s2153_s9 + $0x158] sm:$0xff] }
 0x119   : > { %1646 = vst.msk [vmem:[%s2297_s30 + $0x8] sm:$0xff] %vm1243_vm2, %v1051_v37  ;;  %1956 = vmatmul.msk.f32.gmra.mxu1 %vm837_vm1, %v784_v36  ;;  %2004 = vmatmul.msk.f32.gmra.mxu2 %vm1243_vm2, %v1051_v37 }
 0x11c   : > { %v629_v38 = vpop.f32.mrf.mxu0 }
 0x11d   : > { %v630_v40 = vadd.f32 %v2196_v19, %v629_v38 }
 0x11e   : > { %v1053_v41 = vpop.f32.mrf.mxu1 }
 0x11f   : > { %v785_v42 = vmax.f32 %v630_v40, 0.0  ;;  %v1054_v43 = vadd.f32 %v2289_v25, %v1053_v41  ;;  %1909 = vmatmul.msk.f32.gmra.mxu0 %vm365_vm0, %v330_v39  ;;  %v340_v41 = vld [vmem:[%s2153_s9 + $0x160] sm:$0xff] }
 0x121   : > { %1647 = vst.msk [vmem:[%s2297_s30 + $0x10] sm:$0xff] %vm1243_vm2, %v1054_v43  ;;  %1957 = vmatmul.msk.f32.gmra.mxu1 %vm837_vm1, %v785_v42  ;;  %2005 = vmatmul.msk.f32.gmra.mxu2 %vm1243_vm2, %v1054_v43 }
 0x124   : > { %v632_v44 = vpop.f32.mrf.mxu0 }
 0x125   : > { %v633_v46 = vadd.f32 %v2196_v19, %v632_v44 }
 0x126   : > { %v1056_v47 = vpop.f32.mrf.mxu1 }
 0x127   : > { %v786_v48 = vmax.f32 %v633_v46, 0.0  ;;  %v1057_v49 = vadd.f32 %v2289_v25, %v1056_v47  ;;  %1910 = vmatmul.msk.f32.gmra.mxu0 %vm365_vm0, %v331_v45  ;;  %v345_v46 = vld [vmem:[%s2153_s9 + $0x188] sm:$0xff] }
 0x128   : > { %1924 = vmatmul.msk.f32.vlgmr.msra.gmra.mxu3 %vm365_vm0, %v345_v46 }
 0x129   : > { %1648 = vst.msk [vmem:[%s2297_s30 + $0x18] sm:$0xff] %vm1243_vm2, %v1057_v49  ;;  %1958 = vmatmul.msk.f32.gmra.mxu1 %vm837_vm1, %v786_v48  ;;  %2006 = vmatmul.msk.f32.gmra.mxu2 %vm1243_vm2, %v1057_v49  ;;  %v341_v48 = vld [vmem:[%s2153_s9 + $0x168] sm:$0xff] }
 0x12a   : > { %2072 = vmatpush.msra.mxu3 %v2249_v4 }
 0x12c   : > { %v635_v50 = vpop.f32.mrf.mxu0  ;;  %2073 = vmatpush.msra.mxu3 %v2255_v5  ;;  %v342_v5 = vld [vmem:[%s2153_s9 + $0x170] sm:$0xff] }
 0x12d   : > { %v636_v52 = vadd.f32 %v2196_v19, %v635_v50 }
 0x12e   : > { %v1059_v53 = vpop.f32.mrf.mxu1  ;;  %2074 = vmatpush.msra.mxu3 %v2263_v9 }
 0x12f   : > { %v787_v54 = vmax.f32 %v636_v52, 0.0  ;;  %v1060_v55 = vadd.f32 %v2289_v25, %v1059_v53  ;;  %1911 = vmatmul.msk.f32.gmra.mxu0 %vm365_vm0, %v332_v51  ;;  %v346_v53 = vld [vmem:[%s2153_s9 + $0x190] sm:$0xff] }
 0x130   : > { %1925 = vmatmul.msk.f32.gmra.mxu3 %vm365_vm0, %v346_v53 }
 0x131   : > { %1649 = vst.msk [vmem:[%s2297_s30 + $0x20] sm:$0xff] %vm1243_vm2, %v1060_v55  ;;  %1959 = vmatmul.msk.f32.gmra.mxu1 %vm837_vm1, %v787_v54  ;;  %2007 = vmatmul.msk.f32.gmra.mxu2 %vm1243_vm2, %v1060_v55 }
 0x132   : > { %2075 = vmatpush.msra.mxu3 %v2270_v11 }
 0x134   : > { %v638_v56 = vpop.f32.mrf.mxu0 }
 0x135   : > { %v639_v58 = vadd.f32 %v2196_v19, %v638_v56 }
 0x136   : > { %v1062_v59 = vpop.f32.mrf.mxu1 }
 0x137   : > { %v788_v60 = vmax.f32 %v639_v58, 0.0  ;;  %v1063_v61 = vadd.f32 %v2289_v25, %v1062_v59  ;;  %1912 = vmatmul.msk.f32.gmra.mxu0 %vm365_vm0, %v333_v57  ;;  %v347_v57 = vld [vmem:[%s2153_s9 + $0x198] sm:$0xff] }
 0x138   : > { %1926 = vmatmul.msk.f32.gmra.mxu3 %vm365_vm0, %v347_v57  ;;  %v343_v58 = vld [vmem:[%s2153_s9 + $0x178] sm:$0xff] }
 0x139   : > { %1650 = vst.msk [vmem:[%s2297_s30 + $0x28] sm:$0xff] %vm1243_vm2, %v1063_v61  ;;  %1960 = vmatmul.msk.f32.gmra.mxu1 %vm837_vm1, %v788_v60  ;;  %2008 = vmatmul.msk.f32.gmra.mxu2 %vm1243_vm2, %v1063_v61 }
 0x13c   : > { %v641_v62 = vpop.f32.mrf.mxu0 }
 0x13d   : > { %v642_v0 = vadd.f32 %v2196_v19, %v641_v62 }
 0x13e   : > { %v1065_v1 = vpop.f32.mrf.mxu1 }
 0x13f   : > { %v789_v2 = vmax.f32 %v642_v0, 0.0  ;;  %v1066_v3 = vadd.f32 %v2289_v25, %v1065_v1  ;;  %1913 = vmatmul.msk.f32.gmra.mxu0 %vm365_vm0, %v334_v63  ;;  %v348_v63 = vld [vmem:[%s2153_s9 + $0x1a0] sm:$0xff] }
 0x140   : > { %1927 = vmatmul.msk.f32.gmra.mxu3 %vm365_vm0, %v348_v63  ;;  %v344_v1 = vld [vmem:[%s2153_s9 + $0x180] sm:$0xff] }
 0x141   : > { %1651 = vst.msk [vmem:[%s2297_s30 + $0x30] sm:$0xff] %vm1243_vm2, %v1066_v3  ;;  %1961 = vmatmul.msk.f32.gmra.mxu1 %vm837_vm1, %v789_v2  ;;  %2009 = vmatmul.msk.f32.gmra.mxu2 %vm1243_vm2, %v1066_v3 }
 0x144   : > { %v644_v6 = vpop.f32.mrf.mxu0 }
 0x145   : > { %v645_v8 = vadd.f32 %v2196_v19, %v644_v6 }
 0x146   : > { %v1068_v10 = vpop.f32.mrf.mxu1 }
 0x147   : > { %v790_v12 = vmax.f32 %v645_v8, 0.0  ;;  %v1069_v13 = vadd.f32 %v2289_v25, %v1068_v10  ;;  %1914 = vmatmul.msk.f32.gmra.mxu0 %vm365_vm0, %v335_v7  ;;  %v349_v8 = vld [vmem:[%s2153_s9 + $0x1a8] sm:$0xff] }
 0x148   : > { %1928 = vmatmul.msk.f32.gmra.mxu3 %vm365_vm0, %v349_v8 }
 0x149   : > { %1652 = vst.msk [vmem:[%s2297_s30 + $0x38] sm:$0xff] %vm1243_vm2, %v1069_v13  ;;  %1962 = vmatmul.msk.f32.gmra.mxu1 %vm837_vm1, %v790_v12  ;;  %2010 = vmatmul.msk.f32.gmra.mxu2 %vm1243_vm2, %v1069_v13 }
 0x14c   : > { %v647_v14 = vpop.f32.mrf.mxu0 }
 0x14d   : > { %v648_v16 = vadd.f32 %v2196_v19, %v647_v14 }
 0x14e   : > { %v1071_v17 = vpop.f32.mrf.mxu1 }
 0x14f   : > { %v791_v18 = vmax.f32 %v648_v16, 0.0  ;;  %v1072_v20 = vadd.f32 %v2289_v25, %v1071_v17  ;;  %1915 = vmatmul.msk.f32.gmra.mxu0 %vm365_vm0, %v336_v15  ;;  %v350_v17 = vld [vmem:[%s2153_s9 + $0x1b0] sm:$0xff] }
 0x150   : > { %1929 = vmatmul.msk.f32.gmra.mxu3 %vm365_vm0, %v350_v17 }
 0x151   : > { %1653 = vst.msk [vmem:[%s2297_s30 + $0x40] sm:$0xff] %vm1243_vm2, %v1072_v20  ;;  %1963 = vmatmul.msk.f32.gmra.mxu1 %vm837_vm1, %v791_v18  ;;  %2011 = vmatmul.msk.f32.gmra.mxu2 %vm1243_vm2, %v1072_v20 }
 0x154   : > { %v650_v21 = vpop.f32.mrf.mxu0 }
 0x155   : > { %v651_v23 = vadd.f32 %v2196_v19, %v650_v21 }
 0x156   : > { %v1074_v24 = vpop.f32.mrf.mxu1 }
 0x157   : > { %v792_v26 = vmax.f32 %v651_v23, 0.0  ;;  %v1075_v27 = vadd.f32 %v2289_v25, %v1074_v24  ;;  %1916 = vmatmul.msk.f32.gmra.mxu0 %vm365_vm0, %v337_v22 }
 0x159   : > { %1654 = vst.msk [vmem:[%s2297_s30 + $0x48] sm:$0xff] %vm1243_vm2, %v1075_v27  ;;  %1964 = vmatmul.msk.f32.gmra.mxu1 %vm837_vm1, %v792_v26  ;;  %2012 = vmatmul.msk.f32.gmra.mxu2 %vm1243_vm2, %v1075_v27  ;;  %v351_v26 = vld [vmem:[%s2153_s9 + $0x1b8] sm:$0xff] }
 0x15a   : > { %1930 = vmatmul.msk.f32.gmra.mxu3 %vm365_vm0, %v351_v26 }
 0x15c   : > { %v653_v28 = vpop.f32.mrf.mxu0 }
 0x15d   : > { %v654_v30 = vadd.f32 %v2196_v19, %v653_v28 }
 0x15e   : > { %v1077_v31 = vpop.f32.mrf.mxu1 }
 0x15f   : > { %v793_v32 = vmax.f32 %v654_v30, 0.0  ;;  %v1078_v33 = vadd.f32 %v2289_v25, %v1077_v31  ;;  %1917 = vmatmul.msk.f32.gmra.mxu0 %vm365_vm0, %v338_v29 }
 0x161   : > { %1655 = vst.msk [vmem:[%s2297_s30 + $0x50] sm:$0xff] %vm1243_vm2, %v1078_v33  ;;  %1965 = vmatmul.msk.f32.gmra.mxu1 %vm837_vm1, %v793_v32  ;;  %2013 = vmatmul.msk.f32.gmra.mxu2 %vm1243_vm2, %v1078_v33  ;;  %v352_v33 = vld [vmem:[%s2153_s9 + $0x1c0] sm:$0xff] }
 0x162   : > { %1931 = vmatmul.msk.f32.gmra.mxu3 %vm365_vm0, %v352_v33 }
 0x164   : > { %v656_v34 = vpop.f32.mrf.mxu0 }
 0x165   : > { %v657_v36 = vadd.f32 %v2196_v19, %v656_v34 }
 0x166   : > { %v1080_v37 = vpop.f32.mrf.mxu1 }
 0x167   : > { %v794_v38 = vmax.f32 %v657_v36, 0.0  ;;  %v1081_v39 = vadd.f32 %v2289_v25, %v1080_v37  ;;  %1918 = vmatmul.msk.f32.gmra.mxu0 %vm365_vm0, %v339_v35 }
 0x169   : > { %1656 = vst.msk [vmem:[%s2297_s30 + $0x58] sm:$0xff] %vm1243_vm2, %v1081_v39  ;;  %1966 = vmatmul.msk.f32.gmra.mxu1 %vm837_vm1, %v794_v38  ;;  %2014 = vmatmul.msk.f32.gmra.mxu2 %vm1243_vm2, %v1081_v39 }
 0x16c   : > { %v659_v40 = vpop.f32.mrf.mxu0 }
 0x16d   : > { %v660_v42 = vadd.f32 %v2196_v19, %v659_v40  ;;  %v353_v40 = vld [vmem:[%s2153_s9 + $0x1c8] sm:$0xff] }
 0x16e   : > { %v1083_v43 = vpop.f32.mrf.mxu1  ;;  %1932 = vmatmul.msk.f32.gmra.mxu3 %vm365_vm0, %v353_v40 }
 0x16f   : > { %v795_v44 = vmax.f32 %v660_v42, 0.0  ;;  %v1084_v45 = vadd.f32 %v2289_v25, %v1083_v43  ;;  %1919 = vmatmul.msk.f32.gmra.mxu0 %vm365_vm0, %v340_v41 }
 0x171   : > { %1657 = vst.msk [vmem:[%s2297_s30 + $0x60] sm:$0xff] %vm1243_vm2, %v1084_v45  ;;  %1967 = vmatmul.msk.f32.gmra.mxu1 %vm837_vm1, %v795_v44  ;;  %2015 = vmatmul.msk.f32.gmra.mxu2 %vm1243_vm2, %v1084_v45 }
 0x174   : > { %v662_v47 = vpop.f32.mrf.mxu0 }
 0x175   : > { %v663_v49 = vadd.f32 %v2196_v19, %v662_v47  ;;  %v354_v47 = vld [vmem:[%s2153_s9 + $0x1d0] sm:$0xff] }
 0x176   : > { %v1086_v50 = vpop.f32.mrf.mxu1  ;;  %1933 = vmatmul.msk.f32.gmra.mxu3 %vm365_vm0, %v354_v47 }
 0x177   : > { %v796_v51 = vmax.f32 %v663_v49, 0.0  ;;  %v1087_v52 = vadd.f32 %v2289_v25, %v1086_v50  ;;  %1920 = vmatmul.msk.f32.gmra.mxu0 %vm365_vm0, %v341_v48 }
 0x179   : > { %1658 = vst.msk [vmem:[%s2297_s30 + $0x68] sm:$0xff] %vm1243_vm2, %v1087_v52  ;;  %1968 = vmatmul.msk.f32.gmra.mxu1 %vm837_vm1, %v796_v51  ;;  %2016 = vmatmul.msk.f32.gmra.mxu2 %vm1243_vm2, %v1087_v52 }
 0x17c   : > { %v665_v4 = vpop.f32.mrf.mxu0 }
 0x17d   : > { %v666_v54 = vadd.f32 %v2196_v19, %v665_v4  ;;  %v355_v4 = vld [vmem:[%s2153_s9 + $0x1d8] sm:$0xff] }
 0x17e   : > { %v1089_v55 = vpop.f32.mrf.mxu1  ;;  %1934 = vmatmul.msk.f32.gmra.mxu3 %vm365_vm0, %v355_v4 }
 0x17f   : > { %v797_v56 = vmax.f32 %v666_v54, 0.0  ;;  %v1090_v9 = vadd.f32 %v2289_v25, %v1089_v55  ;;  %1921 = vmatmul.msk.f32.gmra.mxu0 %vm365_vm0, %v342_v5 }
 0x181   : > { %1659 = vst.msk [vmem:[%s2297_s30 + $0x70] sm:$0xff] %vm1243_vm2, %v1090_v9  ;;  %1969 = vmatmul.msk.f32.gmra.mxu1 %vm837_vm1, %v797_v56  ;;  %2017 = vmatmul.msk.f32.gmra.mxu2 %vm1243_vm2, %v1090_v9 }
 0x184   : > { %v668_v11 = vpop.f32.mrf.mxu0 }
 0x185   : > { %v669_v59 = vadd.f32 %v2196_v19, %v668_v11  ;;  %v356_v11 = vld [vmem:[%s2153_s9 + $0x1e0] sm:$0xff] }
 0x186   : > { %v1092_v60 = vpop.f32.mrf.mxu1  ;;  %1935 = vmatmul.msk.f32.gmra.mxu3 %vm365_vm0, %v356_v11 }
 0x187   : > { %v798_v61 = vmax.f32 %v669_v59, 0.0  ;;  %v1093_v62 = vadd.f32 %v2289_v25, %v1092_v60  ;;  %1922 = vmatmul.msk.f32.gmra.mxu0 %vm365_vm0, %v343_v58 }
 0x189   : > { %1660 = vst.msk [vmem:[%s2297_s30 + $0x78] sm:$0xff] %vm1243_vm2, %v1093_v62  ;;  %1970 = vmatmul.msk.f32.gmra.mxu1 %vm837_vm1, %v798_v61  ;;  %2018 = vmatmul.msk.f32.gmra.mxu2 %vm1243_vm2, %v1093_v62 }
 0x18c   : > { %v671_v0 = vpop.f32.mrf.mxu0 }
 0x18d   : > { %v672_v2 = vadd.f32 %v2196_v19, %v671_v0  ;;  %v357_v0 = vld [vmem:[%s2153_s9 + $0x1e8] sm:$0xff] }
 0x18e   : > { %v1095_v3 = vpop.f32.mrf.mxu1  ;;  %1936 = vmatmul.msk.f32.gmra.mxu3 %vm365_vm0, %v357_v0 }
 0x18f   : > { %v799_v6 = vmax.f32 %v672_v2, 0.0  ;;  %v1096_v7 = vadd.f32 %v2289_v25, %v1095_v3  ;;  %1923 = vmatmul.msk.f32.gmra.mxu0 %vm365_vm0, %v344_v1 }
 0x191   : > { %1661 = vst.msk [vmem:[%s2297_s30 + $0x80] sm:$0xff] %vm1243_vm2, %v1096_v7  ;;  %1971 = vmatmul.msk.f32.gmra.mxu1 %vm837_vm1, %v799_v6  ;;  %2019 = vmatmul.msk.f32.gmra.mxu2 %vm1243_vm2, %v1096_v7 }
 0x194   : > { %v674_v10 = vpop.f32.mrf.mxu0  ;;  %v1453_v12 = vpop.f32.mrf.mxu2 }
 0x195   : > { %v675_v13 = vadd.f32 %v2196_v19, %v674_v10  ;;  %1710 = vst.msk [vmem:[%s2450_s11] sm:$0xff] %vm1709_vm3, %v1453_v12  ;;  %v358_v10 = vld [vmem:[%s2153_s9 + $0x1f0] sm:$0xff] }
 0x196   : > { %v1098_v14 = vpop.f32.mrf.mxu1  ;;  %1937 = vmatmul.msk.f32.gmra.mxu3 %vm365_vm0, %v358_v10 }
 0x197   : > { %v800_v15 = vmax.f32 %v675_v13, 0.0  ;;  %v1099_v16 = vadd.f32 %v2289_v25, %v1098_v14 }
 0x199   : > { %1662 = vst.msk [vmem:[%s2297_s30 + $0x88] sm:$0xff] %vm1243_vm2, %v1099_v16  ;;  %1972 = vmatmul.msk.f32.gmra.mxu1 %vm837_vm1, %v800_v15  ;;  %2020 = vmatmul.msk.f32.gmra.mxu2 %vm1243_vm2, %v1099_v16 }
 0x19c   : > { %v677_v18 = vpop.f32.mrf.mxu0  ;;  %v1456_v20 = vpop.f32.mrf.mxu2 }
 0x19d   : > { %v678_v21 = vadd.f32 %v2196_v19, %v677_v18  ;;  %1711 = vst.msk [vmem:[%s2450_s11 + $0x8] sm:$0xff] %vm1709_vm3, %v1456_v20  ;;  %v359_v18 = vld [vmem:[%s2153_s9 + $0x1f8] sm:$0xff] }
 0x19e   : > { %v1101_v22 = vpop.f32.mrf.mxu1  ;;  %1938 = vmatmul.msk.f32.gmra.mxu3 %vm365_vm0, %v359_v18 }
 0x19f   : > { %v801_v23 = vmax.f32 %v678_v21, 0.0  ;;  %v1102_v24 = vadd.f32 %v2289_v25, %v1101_v22 }
 0x1a1   : > { %1663 = vst.msk [vmem:[%s2297_s30 + $0x90] sm:$0xff] %vm1243_vm2, %v1102_v24  ;;  %1973 = vmatmul.msk.f32.gmra.mxu1 %vm837_vm1, %v801_v23  ;;  %2021 = vmatmul.msk.f32.gmra.mxu2 %vm1243_vm2, %v1102_v24 }
 0x1a4   : > { %v680_v27 = vpop.f32.mrf.mxu0  ;;  %v1459_v28 = vpop.f32.mrf.mxu2 }
 0x1a5   : > { %v681_v29 = vadd.f32 %v2196_v19, %v680_v27  ;;  %1712 = vst.msk [vmem:[%s2450_s11 + $0x10] sm:$0xff] %vm1709_vm3, %v1459_v28 }
 0x1a6   : > { %v1104_v30 = vpop.f32.mrf.mxu1 }
 0x1a7   : > { %v802_v31 = vmax.f32 %v681_v29, 0.0  ;;  %v1105_v32 = vadd.f32 %v2289_v25, %v1104_v30 }
 0x1a9   : > { %1664 = vst.msk [vmem:[%s2297_s30 + $0x98] sm:$0xff] %vm1243_vm2, %v1105_v32  ;;  %1974 = vmatmul.msk.f32.gmra.mxu1 %vm837_vm1, %v802_v31  ;;  %2022 = vmatmul.msk.f32.gmra.mxu2 %vm1243_vm2, %v1105_v32 }
 0x1ac   : > { %v683_v34 = vpop.f32.mrf.mxu0  ;;  %v1462_v35 = vpop.f32.mrf.mxu2 }
 0x1ad   : > { %v684_v36 = vadd.f32 %v2196_v19, %v683_v34  ;;  %1713 = vst.msk [vmem:[%s2450_s11 + $0x18] sm:$0xff] %vm1709_vm3, %v1462_v35 }
 0x1ae   : > { %v1107_v37 = vpop.f32.mrf.mxu1 }
 0x1af   : > { %v803_v38 = vmax.f32 %v684_v36, 0.0  ;;  %v1108_v39 = vadd.f32 %v2289_v25, %v1107_v37  ;;  %v722_v36 = vpop.f32.mrf.mxu3 }
 0x1b0   : > { %v723_v11 = vadd.f32 %v2196_v19, %v722_v36 }
 0x1b1   : > { %1665 = vst.msk [vmem:[%s2297_s30 + $0xa0] sm:$0xff] %vm1243_vm2, %v1108_v39  ;;  %1975 = vmatmul.msk.f32.gmra.mxu1 %vm837_vm1, %v803_v38  ;;  %2023 = vmatmul.msk.f32.gmra.mxu2 %vm1243_vm2, %v1108_v39 }
 0x1b4   : > { %v686_v41 = vpop.f32.mrf.mxu0  ;;  %v1465_v42 = vpop.f32.mrf.mxu2 }
 0x1b5   : > { %v687_v43 = vadd.f32 %v2196_v19, %v686_v41  ;;  %1714 = vst.msk [vmem:[%s2450_s11 + $0x20] sm:$0xff] %vm1709_vm3, %v1465_v42 }
 0x1b6   : > { %v1110_v44 = vpop.f32.mrf.mxu1 }
 0x1b7   : > { %v804_v45 = vmax.f32 %v687_v43, 0.0  ;;  %v1111_v46 = vadd.f32 %v2289_v25, %v1110_v44  ;;  %v725_v43 = vpop.f32.mrf.mxu3 }
 0x1b9   : > { %1666 = vst.msk [vmem:[%s2297_s30 + $0xa8] sm:$0xff] %vm1243_vm2, %v1111_v46  ;;  %1976 = vmatmul.msk.f32.gmra.mxu1 %vm837_vm1, %v804_v45  ;;  %2024 = vmatmul.msk.f32.gmra.mxu2 %vm1243_vm2, %v1111_v46 }
 0x1bc   : > { %v689_v48 = vpop.f32.mrf.mxu0  ;;  %v1468_v49 = vpop.f32.mrf.mxu2 }
 0x1bd   : > { %v690_v50 = vadd.f32 %v2196_v19, %v689_v48  ;;  %1715 = vst.msk [vmem:[%s2450_s11 + $0x28] sm:$0xff] %vm1709_vm3, %v1468_v49 }
 0x1be   : > { %v1113_v51 = vpop.f32.mrf.mxu1 }
 0x1bf   : > { %v805_v52 = vmax.f32 %v690_v50, 0.0  ;;  %v1114_v53 = vadd.f32 %v2289_v25, %v1113_v51  ;;  %v728_v51 = vpop.f32.mrf.mxu3 }
 0x1c1   : > { %1667 = vst.msk [vmem:[%s2297_s30 + $0xb0] sm:$0xff] %vm1243_vm2, %v1114_v53  ;;  %1977 = vmatmul.msk.f32.gmra.mxu1 %vm837_vm1, %v805_v52  ;;  %2025 = vmatmul.msk.f32.gmra.mxu2 %vm1243_vm2, %v1114_v53 }
 0x1c4   : > { %v692_v5 = vpop.f32.mrf.mxu0  ;;  %v1471_v54 = vpop.f32.mrf.mxu2 }
 0x1c5   : > { %v693_v55 = vadd.f32 %v2196_v19, %v692_v5  ;;  %1716 = vst.msk [vmem:[%s2450_s11 + $0x30] sm:$0xff] %vm1709_vm3, %v1471_v54 }
 0x1c6   : > { %v1116_v56 = vpop.f32.mrf.mxu1 }
 0x1c7   : > { %v806_v9 = vmax.f32 %v693_v55, 0.0  ;;  %v1117_v57 = vadd.f32 %v2289_v25, %v1116_v56 }
 0x1c9   : > { %1668 = vst.msk [vmem:[%s2297_s30 + $0xb8] sm:$0xff] %vm1243_vm2, %v1117_v57  ;;  %1978 = vmatmul.msk.f32.gmra.mxu1 %vm837_vm1, %v806_v9  ;;  %2026 = vmatmul.msk.f32.gmra.mxu2 %vm1243_vm2, %v1117_v57  ;;  %v731_v57 = vpop.f32.mrf.mxu3 }
 0x1cc   : > { %v695_v58 = vpop.f32.mrf.mxu0  ;;  %v1474_v59 = vpop.f32.mrf.mxu2 }
 0x1cd   : > { %v696_v60 = vadd.f32 %v2196_v19, %v695_v58  ;;  %1717 = vst.msk [vmem:[%s2450_s11 + $0x38] sm:$0xff] %vm1709_vm3, %v1474_v59  ;;  %v816_v59 = vmax.f32 %v723_v11, 0.0 }
 0x1ce   : > { %v1119_v61 = vpop.f32.mrf.mxu1 }
 0x1cf   : > { %v807_v62 = vmax.f32 %v696_v60, 0.0  ;;  %v1120_v63 = vadd.f32 %v2289_v25, %v1119_v61 }
 0x1d1   : > { %1669 = vst.msk [vmem:[%s2297_s30 + $0xc0] sm:$0xff] %vm1243_vm2, %v1120_v63  ;;  %1979 = vmatmul.msk.f32.gmra.mxu1 %vm837_vm1, %v807_v62  ;;  %2027 = vmatmul.msk.f32.gmra.mxu2 %vm1243_vm2, %v1120_v63  ;;  %v726_v62 = vadd.f32 %v2196_v19, %v725_v43  ;;  %v734_v63 = vpop.f32.mrf.mxu3 }
 0x1d4   : > { %v698_v1 = vpop.f32.mrf.mxu0  ;;  %v1477_v2 = vpop.f32.mrf.mxu2 }
 0x1d5   : > { %v699_v3 = vadd.f32 %v2196_v19, %v698_v1  ;;  %1718 = vst.msk [vmem:[%s2450_s11 + $0x40] sm:$0xff] %vm1709_vm3, %v1477_v2  ;;  %v817_v1 = vmax.f32 %v726_v62, 0.0 }
 0x1d6   : > { %v1122_v6 = vpop.f32.mrf.mxu1 }
 0x1d7   : > { %v808_v7 = vmax.f32 %v699_v3, 0.0  ;;  %v1123_v8 = vadd.f32 %v2289_v25, %v1122_v6  ;;  %v729_v6 = vadd.f32 %v2196_v19, %v728_v51 }
 0x1d9   : > { %1670 = vst.msk [vmem:[%s2297_s30 + $0xc8] sm:$0xff] %vm1243_vm2, %v1123_v8  ;;  %1980 = vmatmul.msk.f32.gmra.mxu1 %vm837_vm1, %v808_v7  ;;  %2028 = vmatmul.msk.f32.gmra.mxu2 %vm1243_vm2, %v1123_v8  ;;  %v737_v8 = vpop.f32.mrf.mxu3  ;;  %v818_v10 = vmax.f32 %v729_v6, 0.0 }
 0x1dc   : > { %v701_v12 = vpop.f32.mrf.mxu0  ;;  %v1480_v13 = vpop.f32.mrf.mxu2 }
 0x1dd   : > { %v702_v14 = vadd.f32 %v2196_v19, %v701_v12  ;;  %1719 = vst.msk [vmem:[%s2450_s11 + $0x48] sm:$0xff] %vm1709_vm3, %v1480_v13 }
 0x1de   : > { %v1125_v15 = vpop.f32.mrf.mxu1 }
 0x1df   : > { %v809_v16 = vmax.f32 %v702_v14, 0.0  ;;  %v1126_v17 = vadd.f32 %v2289_v25, %v1125_v15  ;;  %v732_v14 = vadd.f32 %v2196_v19, %v731_v57 }
 0x1e1   : > { %1671 = vst.msk [vmem:[%s2297_s30 + $0xd0] sm:$0xff] %vm1243_vm2, %v1126_v17  ;;  %1981 = vmatmul.msk.f32.gmra.mxu1 %vm837_vm1, %v809_v16  ;;  %2029 = vmatmul.msk.f32.gmra.mxu2 %vm1243_vm2, %v1126_v17  ;;  %v819_v16 = vmax.f32 %v732_v14, 0.0  ;;  %v740_v18 = vpop.f32.mrf.mxu3 }
 0x1e4   : > { %v704_v20 = vpop.f32.mrf.mxu0  ;;  %v1483_v21 = vpop.f32.mrf.mxu2 }
 0x1e5   : > { %v705_v22 = vadd.f32 %v2196_v19, %v704_v20  ;;  %1720 = vst.msk [vmem:[%s2450_s11 + $0x50] sm:$0xff] %vm1709_vm3, %v1483_v21 }
 0x1e6   : > { %v1128_v23 = vpop.f32.mrf.mxu1 }
 0x1e7   : > { %v810_v24 = vmax.f32 %v705_v22, 0.0  ;;  %v1129_v26 = vadd.f32 %v2289_v25, %v1128_v23 }
 0x1e9   : > { %1672 = vst.msk [vmem:[%s2297_s30 + $0xd8] sm:$0xff] %vm1243_vm2, %v1129_v26  ;;  %1982 = vmatmul.msk.f32.gmra.mxu1 %vm837_vm1, %v810_v24  ;;  %2030 = vmatmul.msk.f32.gmra.mxu2 %vm1243_vm2, %v1129_v26 }
 0x1ec   : > { %v707_v27 = vpop.f32.mrf.mxu0  ;;  %v1486_v28 = vpop.f32.mrf.mxu2 }
 0x1ed   : > { %v708_v29 = vadd.f32 %v2196_v19, %v707_v27  ;;  %1721 = vst.msk [vmem:[%s2450_s11 + $0x58] sm:$0xff] %vm1709_vm3, %v1486_v28  ;;  %v743_v27 = vpop.f32.mrf.mxu3 }
 0x1ee   : > { %v1131_v30 = vpop.f32.mrf.mxu1 }
 0x1ef   : > { %v811_v31 = vmax.f32 %v708_v29, 0.0  ;;  %v1132_v32 = vadd.f32 %v2289_v25, %v1131_v30 }
 0x1f1   : > { %1673 = vst.msk [vmem:[%s2297_s30 + $0xe0] sm:$0xff] %vm1243_vm2, %v1132_v32  ;;  %1983 = vmatmul.msk.f32.gmra.mxu1 %vm837_vm1, %v811_v31  ;;  %2031 = vmatmul.msk.f32.gmra.mxu2 %vm1243_vm2, %v1132_v32 }
 0x1f4   : > { %v710_v33 = vpop.f32.mrf.mxu0  ;;  %v1489_v34 = vpop.f32.mrf.mxu2 }
 0x1f5   : > { %v711_v35 = vadd.f32 %v2196_v19, %v710_v33  ;;  %1722 = vst.msk [vmem:[%s2450_s11 + $0x60] sm:$0xff] %vm1709_vm3, %v1489_v34  ;;  %v746_v34 = vpop.f32.mrf.mxu3 }
 0x1f6   : > { %v1134_v37 = vpop.f32.mrf.mxu1 }
 0x1f7   : > { %v812_v38 = vmax.f32 %v711_v35, 0.0  ;;  %v1135_v39 = vadd.f32 %v2289_v25, %v1134_v37 }
 0x1f9   : > { %1674 = vst.msk [vmem:[%s2297_s30 + $0xe8] sm:$0xff] %vm1243_vm2, %v1135_v39  ;;  %1984 = vmatmul.msk.f32.gmra.mxu1 %vm837_vm1, %v812_v38  ;;  %2032 = vmatmul.msk.f32.gmra.mxu2 %vm1243_vm2, %v1135_v39 }
 0x1fc   : > { %v713_v40 = vpop.f32.mrf.mxu0  ;;  %v1492_v41 = vpop.f32.mrf.mxu2 }
 0x1fd   : > { %v714_v42 = vadd.f32 %v2196_v19, %v713_v40  ;;  %1723 = vst.msk [vmem:[%s2450_s11 + $0x68] sm:$0xff] %vm1709_vm3, %v1492_v41  ;;  %v749_v41 = vpop.f32.mrf.mxu3 }
 0x1fe   : > { %v1137_v44 = vpop.f32.mrf.mxu1 }
 0x1ff   : > { %v813_v45 = vmax.f32 %v714_v42, 0.0  ;;  %v1138_v46 = vadd.f32 %v2289_v25, %v1137_v44 }
 0x201   : > { %1675 = vst.msk [vmem:[%s2297_s30 + $0xf0] sm:$0xff] %vm1243_vm2, %v1138_v46  ;;  %1985 = vmatmul.msk.f32.gmra.mxu1 %vm837_vm1, %v813_v45  ;;  %2033 = vmatmul.msk.f32.gmra.mxu2 %vm1243_vm2, %v1138_v46 }
 0x204   : > { %v716_v47 = vpop.f32.mrf.mxu0  ;;  %v1495_v48 = vpop.f32.mrf.mxu2 }
 0x205   : > { %v717_v49 = vadd.f32 %v2196_v19, %v716_v47  ;;  %1724 = vst.msk [vmem:[%s2450_s11 + $0x70] sm:$0xff] %vm1709_vm3, %v1495_v48 }
 0x206   : > { %v1140_v50 = vpop.f32.mrf.mxu1 }
 0x207   : > { %v814_v52 = vmax.f32 %v717_v49, 0.0  ;;  %v1141_v53 = vadd.f32 %v2289_v25, %v1140_v50  ;;  %v752_v49 = vpop.f32.mrf.mxu3 }
 0x209   : > { %1676 = vst.msk [vmem:[%s2297_s30 + $0xf8] sm:$0xff] %vm1243_vm2, %v1141_v53  ;;  %1986 = vmatmul.msk.f32.gmra.mxu1 %vm837_vm1, %v814_v52  ;;  %2034 = vmatmul.msk.f32.gmra.mxu2 %vm1243_vm2, %v1141_v53 }
 0x20c   : > { %v719_v4 = vpop.f32.mrf.mxu0  ;;  %v1498_v5 = vpop.f32.mrf.mxu2 }
 0x20d   : > { %v720_v54 = vadd.f32 %v2196_v19, %v719_v4  ;;  %1725 = vst.msk [vmem:[%s2450_s11 + $0x78] sm:$0xff] %vm1709_vm3, %v1498_v5  ;;  %v2636_v19 = vld [vmem:[%s2866_s2] ss:$0 sm:$0xff] }
 0x20e   : > { %v1143_v55 = vpop.f32.mrf.mxu1  ;;  %v735_v21 = vadd.f32 %v2636_v19, %v734_v63  ;;  %v738_v28 = vadd.f32 %v2636_v19, %v737_v8  ;;  %v741_v33 = vadd.f32 %v2636_v19, %v740_v18  ;;  %v744_v39 = vadd.f32 %v2636_v19, %v743_v27 }
 0x20f   : > { %v815_v56 = vmax.f32 %v720_v54, 0.0  ;;  %v1144_v9 = vadd.f32 %v2289_v25, %v1143_v55  ;;  %v747_v45 = vadd.f32 %v2636_v19, %v746_v34  ;;  %v750_v51 = vadd.f32 %v2636_v19, %v749_v41  ;;  %v755_v54 = vpop.f32.mrf.mxu3 }
 0x210   : > { %v820_v23 = vmax.f32 %v735_v21, 0.0  ;;  %v821_v30 = vmax.f32 %v738_v28, 0.0  ;;  %v822_v36 = vmax.f32 %v741_v33, 0.0  ;;  %v823_v42 = vmax.f32 %v744_v39, 0.0  ;;  %v2724_v21 = vld [vmem:[%s2868_s4] ss:$0 sm:$0xff] }
 0x211   : > { %1677 = vst.msk [vmem:[%s2297_s30 + $0x100] sm:$0xff] %vm1243_vm2, %v1144_v9  ;;  %1987 = vmatmul.msk.f32.vlgmr.msrb.gmra.mxu3 %vm837_vm1, %v815_v56  ;;  %2035 = vmatmul.msk.f32.gmra.mxu2 %vm1243_vm2, %v1144_v9  ;;  %v824_v47 = vmax.f32 %v747_v45, 0.0  ;;  %v825_v53 = vmax.f32 %v750_v51, 0.0  ;;  %v753_v55 = vadd.f32 %v2636_v19, %v752_v49 }
 0x213   : > { %v826_v9 = vmax.f32 %v753_v55, 0.0 }
 0x214   : > { %v1501_v58 = vpop.f32.mrf.mxu2 }
 0x215   : > { %1726 = vst.msk [vmem:[%s2450_s11 + $0x80] sm:$0xff] %vm1709_vm3, %v1501_v58  ;;  %v756_v58 = vadd.f32 %v2636_v19, %v755_v54 }
 0x216   : > { %v1146_v60 = vpop.f32.mrf.mxu1 }
 0x217   : > { %v1147_v61 = vadd.f32 %v2289_v25, %v1146_v60 }
 0x219   : > { %1678 = vst.msk [vmem:[%s2297_s30 + $0x108] sm:$0xff] %vm1243_vm2, %v1147_v61  ;;  %1988 = vmatmul.msk.f32.gmra.mxu3 %vm837_vm1, %v816_v59  ;;  %2036 = vmatmul.msk.f32.gmra.mxu2 %vm1243_vm2, %v1147_v61  ;;  %v758_v59 = vpop.f32.mrf.mxu3  ;;  %v827_v61 = vmax.f32 %v756_v58, 0.0 }
 0x21c   : > { %v1504_v0 = vpop.f32.mrf.mxu2 }
 0x21d   : > { %1727 = vst.msk [vmem:[%s2450_s11 + $0x88] sm:$0xff] %vm1709_vm3, %v1504_v0  ;;  %v759_v0 = vadd.f32 %v2636_v19, %v758_v59 }
 0x21e   : > { %v1149_v2 = vpop.f32.mrf.mxu1 }
 0x21f   : > { %v1150_v3 = vadd.f32 %v2289_v25, %v1149_v2 }
 0x221   : > { %1679 = vst.msk [vmem:[%s2297_s30 + $0x110] sm:$0xff] %vm1243_vm2, %v1150_v3  ;;  %1989 = vmatmul.msk.f32.gmra.mxu3 %vm837_vm1, %v817_v1  ;;  %2037 = vmatmul.msk.f32.gmra.mxu2 %vm1243_vm2, %v1150_v3  ;;  %v761_v2 = vpop.f32.mrf.mxu3  ;;  %v828_v3 = vmax.f32 %v759_v0, 0.0 }
 0x222   : > { %v762_v8 = vadd.f32 %v2636_v19, %v761_v2 }
 0x224   : > { %v1507_v7 = vpop.f32.mrf.mxu2 }
 0x225   : > { %1728 = vst.msk [vmem:[%s2450_s11 + $0x90] sm:$0xff] %vm1709_vm3, %v1507_v7 }
 0x226   : > { %v1152_v12 = vpop.f32.mrf.mxu1 }
 0x227   : > { %v1153_v13 = vadd.f32 %v2289_v25, %v1152_v12  ;;  %v829_v12 = vmax.f32 %v762_v8, 0.0 }
 0x229   : > { %1680 = vst.msk [vmem:[%s2297_s30 + $0x118] sm:$0xff] %vm1243_vm2, %v1153_v13  ;;  %1990 = vmatmul.msk.f32.gmra.mxu3 %vm837_vm1, %v818_v10  ;;  %2038 = vmatmul.msk.f32.gmra.mxu2 %vm1243_vm2, %v1153_v13  ;;  %v764_v14 = vpop.f32.mrf.mxu3 }
 0x22c   : > { %v1510_v15 = vpop.f32.mrf.mxu2 }
 0x22d   : > { %1729 = vst.msk [vmem:[%s2450_s11 + $0x98] sm:$0xff] %vm1709_vm3, %v1510_v15 }
 0x22e   : > { %v1155_v17 = vpop.f32.mrf.mxu1 }
 0x22f   : > { %v1156_v20 = vadd.f32 %v2289_v25, %v1155_v17 }
 0x231   : > { %1681 = vst.msk [vmem:[%s2297_s30 + $0x120] sm:$0xff] %vm1243_vm2, %v1156_v20  ;;  %1991 = vmatmul.msk.f32.gmra.mxu3 %vm837_vm1, %v819_v16  ;;  %2039 = vmatmul.msk.f32.gmra.mxu2 %vm1243_vm2, %v1156_v20  ;;  %v765_v16 = vadd.f32 %v2636_v19, %v764_v14 }
 0x233   : > { %v830_v18 = vmax.f32 %v765_v16, 0.0 }
 0x234   : > { %v1513_v22 = vpop.f32.mrf.mxu2 }
 0x235   : > { %1730 = vst.msk [vmem:[%s2450_s11 + $0xa0] sm:$0xff] %vm1709_vm3, %v1513_v22 }
 0x236   : > { %v1158_v24 = vpop.f32.mrf.mxu1 }
 0x237   : > { %v1159_v26 = vadd.f32 %v2289_v25, %v1158_v24 }
 0x239   : > { %1682 = vst.msk [vmem:[%s2297_s30 + $0x128] sm:$0xff] %vm1243_vm2, %v1159_v26  ;;  %1992 = vmatmul.msk.f32.gmra.mxu3 %vm837_vm1, %v820_v23  ;;  %2040 = vmatmul.msk.f32.gmra.mxu2 %vm1243_vm2, %v1159_v26 }
 0x23c   : > { %v1516_v29 = vpop.f32.mrf.mxu2 }
 0x23d   : > { %1731 = vst.msk [vmem:[%s2450_s11 + $0xa8] sm:$0xff] %vm1709_vm3, %v1516_v29 }
 0x23e   : > { %v1161_v31 = vpop.f32.mrf.mxu1 }
 0x23f   : > { %v1162_v32 = vadd.f32 %v2289_v25, %v1161_v31 }
 0x241   : > { %1683 = vst.msk [vmem:[%s2297_s30 + $0x130] sm:$0xff] %vm1243_vm2, %v1162_v32  ;;  %1993 = vmatmul.msk.f32.gmra.mxu3 %vm837_vm1, %v821_v30  ;;  %2041 = vmatmul.msk.f32.gmra.mxu2 %vm1243_vm2, %v1162_v32 }
 0x244   : > { %v1519_v35 = vpop.f32.mrf.mxu2 }
 0x245   : > { %1732 = vst.msk [vmem:[%s2450_s11 + $0xb0] sm:$0xff] %vm1709_vm3, %v1519_v35 }
 0x246   : > { %v1164_v37 = vpop.f32.mrf.mxu1 }
 0x247   : > { %v1165_v38 = vadd.f32 %v2289_v25, %v1164_v37 }
 0x249   : > { %1684 = vst.msk [vmem:[%s2297_s30 + $0x138] sm:$0xff] %vm1243_vm2, %v1165_v38  ;;  %1994 = vmatmul.msk.f32.gmra.mxu3 %vm837_vm1, %v822_v36  ;;  %2042 = vmatmul.msk.f32.gmra.mxu2 %vm1243_vm2, %v1165_v38 }
 0x24c   : > { %v1522_v40 = vpop.f32.mrf.mxu2 }
 0x24d   : > { %1733 = vst.msk [vmem:[%s2450_s11 + $0xb8] sm:$0xff] %vm1709_vm3, %v1522_v40 }
 0x24e   : > { %v1167_v43 = vpop.f32.mrf.mxu1 }
 0x24f   : > { %v1168_v44 = vadd.f32 %v2289_v25, %v1167_v43 }
 0x251   : > { %1685 = vst.msk [vmem:[%s2297_s30 + $0x140] sm:$0xff] %vm1243_vm2, %v1168_v44  ;;  %1995 = vmatmul.msk.f32.gmra.mxu3 %vm837_vm1, %v823_v42  ;;  %2043 = vmatmul.msk.f32.gmra.mxu2 %vm1243_vm2, %v1168_v44 }
 0x254   : > { %v1525_v46 = vpop.f32.mrf.mxu2 }
 0x255   : > { %1734 = vst.msk [vmem:[%s2450_s11 + $0xc0] sm:$0xff] %vm1709_vm3, %v1525_v46 }
 0x256   : > { %v1170_v48 = vpop.f32.mrf.mxu1 }
 0x257   : > { %v1171_v50 = vadd.f32 %v2289_v25, %v1170_v48 }
 0x259   : > { %1686 = vst.msk [vmem:[%s2297_s30 + $0x148] sm:$0xff] %vm1243_vm2, %v1171_v50  ;;  %1996 = vmatmul.msk.f32.gmra.mxu3 %vm837_vm1, %v824_v47  ;;  %2044 = vmatmul.msk.f32.gmra.mxu2 %vm1243_vm2, %v1171_v50 }
 0x25c   : > { %v1528_v52 = vpop.f32.mrf.mxu2 }
 0x25d   : > { %1735 = vst.msk [vmem:[%s2450_s11 + $0xc8] sm:$0xff] %vm1709_vm3, %v1528_v52 }
 0x25e   : > { %v1173_v4 = vpop.f32.mrf.mxu1 }
 0x25f   : > { %v1174_v5 = vadd.f32 %v2289_v25, %v1173_v4 }
 0x261   : > { %1687 = vst.msk [vmem:[%s2297_s30 + $0x150] sm:$0xff] %vm1243_vm2, %v1174_v5  ;;  %1997 = vmatmul.msk.f32.gmra.mxu3 %vm837_vm1, %v825_v53  ;;  %2045 = vmatmul.msk.f32.gmra.mxu2 %vm1243_vm2, %v1174_v5 }
 0x264   : > { %v1531_v56 = vpop.f32.mrf.mxu2 }
 0x265   : > { %1736 = vst.msk [vmem:[%s2450_s11 + $0xd0] sm:$0xff] %vm1709_vm3, %v1531_v56 }
 0x266   : > { %v1176_v57 = vpop.f32.mrf.mxu1 }
 0x267   : > { %v1177_v11 = vadd.f32 %v2289_v25, %v1176_v57 }
 0x269   : > { %1688 = vst.msk [vmem:[%s2297_s30 + $0x158] sm:$0xff] %vm1243_vm2, %v1177_v11  ;;  %1998 = vmatmul.msk.f32.gmra.mxu3 %vm837_vm1, %v826_v9  ;;  %2046 = vmatmul.msk.f32.gmra.mxu2 %vm1243_vm2, %v1177_v11 }
 0x26c   : > { %v1534_v60 = vpop.f32.mrf.mxu2 }
 0x26d   : > { %1737 = vst.msk [vmem:[%s2450_s11 + $0xd8] sm:$0xff] %vm1709_vm3, %v1534_v60 }
 0x26e   : > { %v1179_v62 = vpop.f32.mrf.mxu1 }
 0x26f   : > { %v1180_v63 = vadd.f32 %v2289_v25, %v1179_v62 }
 0x271   : > { %1689 = vst.msk [vmem:[%s2297_s30 + $0x160] sm:$0xff] %vm1243_vm2, %v1180_v63  ;;  %1999 = vmatmul.msk.f32.gmra.mxu3 %vm837_vm1, %v827_v61  ;;  %2047 = vmatmul.msk.f32.gmra.mxu2 %vm1243_vm2, %v1180_v63 }
 0x274   : > { %v1537_v1 = vpop.f32.mrf.mxu2 }
 0x275   : > { %1738 = vst.msk [vmem:[%s2450_s11 + $0xe0] sm:$0xff] %vm1709_vm3, %v1537_v1 }
 0x276   : > { %v1182_v6 = vpop.f32.mrf.mxu1 }
 0x277   : > { %v1183_v7 = vadd.f32 %v2289_v25, %v1182_v6 }
 0x279   : > { %1690 = vst.msk [vmem:[%s2297_s30 + $0x168] sm:$0xff] %vm1243_vm2, %v1183_v7  ;;  %2000 = vmatmul.msk.f32.gmra.mxu3 %vm837_vm1, %v828_v3  ;;  %2048 = vmatmul.msk.f32.gmra.mxu2 %vm1243_vm2, %v1183_v7 }
 0x27c   : > { %v1540_v10 = vpop.f32.mrf.mxu2 }
 0x27d   : > { %1739 = vst.msk [vmem:[%s2450_s11 + $0xe8] sm:$0xff] %vm1709_vm3, %v1540_v10 }
 0x27e   : > { %v1185_v13 = vpop.f32.mrf.mxu1 }
 0x27f   : > { %v1186_v15 = vadd.f32 %v2289_v25, %v1185_v13 }
 0x281   : > { %1691 = vst.msk [vmem:[%s2297_s30 + $0x170] sm:$0xff] %vm1243_vm2, %v1186_v15  ;;  %2001 = vmatmul.msk.f32.gmra.mxu3 %vm837_vm1, %v829_v12  ;;  %2049 = vmatmul.msk.f32.gmra.mxu2 %vm1243_vm2, %v1186_v15 }
 0x284   : > { %v1543_v17 = vpop.f32.mrf.mxu2 }
 0x285   : > { %1740 = vst.msk [vmem:[%s2450_s11 + $0xf0] sm:$0xff] %vm1709_vm3, %v1543_v17 }
 0x286   : > { %v1188_v20 = vpop.f32.mrf.mxu1 }
 0x287   : > { %v1189_v25 = vadd.f32 %v2724_v21, %v1188_v20 }
 0x289   : > { %1692 = vst.msk [vmem:[%s2297_s30 + $0x178] sm:$0xff] %vm1243_vm2, %v1189_v25  ;;  %2002 = vmatmul.msk.f32.gmra.mxu3 %vm837_vm1, %v830_v18  ;;  %2050 = vmatmul.msk.f32.gmra.mxu2 %vm1243_vm2, %v1189_v25 }
 0x28c   : > { %v1546_v19 = vpop.f32.mrf.mxu2 }
 0x28d   : > { %1741 = vst.msk [vmem:[%s2450_s11 + $0xf8] sm:$0xff] %vm1709_vm3, %v1546_v19 }
 0x294   : > { %v1191_v22 = vpop.f32.mrf.mxu3  ;;  %v1549_v23 = vpop.f32.mrf.mxu2 }
 0x295   : > { %v1192_v24 = vadd.f32 %v2724_v21, %v1191_v22  ;;  %1742 = vst.msk [vmem:[%s2450_s11 + $0x100] sm:$0xff] %vm1709_vm3, %v1549_v23 }
 0x297   : > { %1693 = vst.msk [vmem:[%s2297_s30 + $0x180] sm:$0xff] %vm1243_vm2, %v1192_v24  ;;  %2051 = vmatmul.msk.f32.vlgmr.msra.gmra.mxu3 %vm1243_vm2, %v1192_v24 }
 0x29c   : > { %v1194_v26 = vpop.f32.mrf.mxu3  ;;  %v1552_v27 = vpop.f32.mrf.mxu2 }
 0x29d   : > { %v1195_v28 = vadd.f32 %v2724_v21, %v1194_v26  ;;  %1743 = vst.msk [vmem:[%s2450_s11 + $0x108] sm:$0xff] %vm1709_vm3, %v1552_v27 }
 0x29f   : > { %1694 = vst.msk [vmem:[%s2297_s30 + $0x188] sm:$0xff] %vm1243_vm2, %v1195_v28  ;;  %2052 = vmatmul.msk.f32.gmra.mxu3 %vm1243_vm2, %v1195_v28 }
 0x2a4   : > { %v1197_v29 = vpop.f32.mrf.mxu3  ;;  %v1555_v30 = vpop.f32.mrf.mxu2 }
 0x2a5   : > { %v1198_v31 = vadd.f32 %v2724_v21, %v1197_v29  ;;  %1744 = vst.msk [vmem:[%s2450_s11 + $0x110] sm:$0xff] %vm1709_vm3, %v1555_v30 }
 0x2a7   : > { %1695 = vst.msk [vmem:[%s2297_s30 + $0x190] sm:$0xff] %vm1243_vm2, %v1198_v31  ;;  %2053 = vmatmul.msk.f32.gmra.mxu3 %vm1243_vm2, %v1198_v31 }
 0x2ac   : > { %v1200_v32 = vpop.f32.mrf.mxu3  ;;  %v1558_v33 = vpop.f32.mrf.mxu2 }
 0x2ad   : > { %v1201_v34 = vadd.f32 %v2724_v21, %v1200_v32  ;;  %1745 = vst.msk [vmem:[%s2450_s11 + $0x118] sm:$0xff] %vm1709_vm3, %v1558_v33 }
 0x2af   : > { %1696 = vst.msk [vmem:[%s2297_s30 + $0x198] sm:$0xff] %vm1243_vm2, %v1201_v34  ;;  %2054 = vmatmul.msk.f32.gmra.mxu3 %vm1243_vm2, %v1201_v34 }
 0x2b4   : > { %v1203_v35 = vpop.f32.mrf.mxu3  ;;  %v1561_v36 = vpop.f32.mrf.mxu2 }
 0x2b5   : > { %v1204_v37 = vadd.f32 %v2724_v21, %v1203_v35  ;;  %1746 = vst.msk [vmem:[%s2450_s11 + $0x120] sm:$0xff] %vm1709_vm3, %v1561_v36 }
 0x2b7   : > { %1697 = vst.msk [vmem:[%s2297_s30 + $0x1a0] sm:$0xff] %vm1243_vm2, %v1204_v37  ;;  %2055 = vmatmul.msk.f32.gmra.mxu3 %vm1243_vm2, %v1204_v37 }
 0x2bc   : > { %v1206_v38 = vpop.f32.mrf.mxu3  ;;  %v1564_v39 = vpop.f32.mrf.mxu2 }
 0x2bd   : > { %v1207_v40 = vadd.f32 %v2724_v21, %v1206_v38  ;;  %1747 = vst.msk [vmem:[%s2450_s11 + $0x128] sm:$0xff] %vm1709_vm3, %v1564_v39 }
 0x2bf   : > { %1698 = vst.msk [vmem:[%s2297_s30 + $0x1a8] sm:$0xff] %vm1243_vm2, %v1207_v40  ;;  %2056 = vmatmul.msk.f32.gmra.mxu3 %vm1243_vm2, %v1207_v40 }
 0x2c4   : > { %v1209_v41 = vpop.f32.mrf.mxu3  ;;  %v1567_v42 = vpop.f32.mrf.mxu2 }
 0x2c5   : > { %v1210_v43 = vadd.f32 %v2724_v21, %v1209_v41  ;;  %1748 = vst.msk [vmem:[%s2450_s11 + $0x130] sm:$0xff] %vm1709_vm3, %v1567_v42 }
 0x2c7   : > { %1699 = vst.msk [vmem:[%s2297_s30 + $0x1b0] sm:$0xff] %vm1243_vm2, %v1210_v43  ;;  %2057 = vmatmul.msk.f32.gmra.mxu3 %vm1243_vm2, %v1210_v43 }
 0x2cc   : > { %v1212_v44 = vpop.f32.mrf.mxu3  ;;  %v1570_v45 = vpop.f32.mrf.mxu2 }
 0x2cd   : > { %v1213_v46 = vadd.f32 %v2724_v21, %v1212_v44  ;;  %1749 = vst.msk [vmem:[%s2450_s11 + $0x138] sm:$0xff] %vm1709_vm3, %v1570_v45 }
 0x2cf   : > { %1700 = vst.msk [vmem:[%s2297_s30 + $0x1b8] sm:$0xff] %vm1243_vm2, %v1213_v46  ;;  %2058 = vmatmul.msk.f32.gmra.mxu3 %vm1243_vm2, %v1213_v46 }
 0x2d4   : > { %v1215_v47 = vpop.f32.mrf.mxu3  ;;  %v1573_v48 = vpop.f32.mrf.mxu2 }
 0x2d5   : > { %v1216_v49 = vadd.f32 %v2724_v21, %v1215_v47  ;;  %1750 = vst.msk [vmem:[%s2450_s11 + $0x140] sm:$0xff] %vm1709_vm3, %v1573_v48 }
 0x2d7   : > { %1701 = vst.msk [vmem:[%s2297_s30 + $0x1c0] sm:$0xff] %vm1243_vm2, %v1216_v49  ;;  %2059 = vmatmul.msk.f32.gmra.mxu3 %vm1243_vm2, %v1216_v49 }
 0x2dc   : > { %v1218_v50 = vpop.f32.mrf.mxu3  ;;  %v1576_v51 = vpop.f32.mrf.mxu2 }
 0x2dd   : > { %v1219_v52 = vadd.f32 %v2724_v21, %v1218_v50  ;;  %1751 = vst.msk [vmem:[%s2450_s11 + $0x148] sm:$0xff] %vm1709_vm3, %v1576_v51 }
 0x2df   : > { %1702 = vst.msk [vmem:[%s2297_s30 + $0x1c8] sm:$0xff] %vm1243_vm2, %v1219_v52  ;;  %2060 = vmatmul.msk.f32.gmra.mxu3 %vm1243_vm2, %v1219_v52 }
 0x2e4   : > { %v1221_v53 = vpop.f32.mrf.mxu3  ;;  %v1579_v4 = vpop.f32.mrf.mxu2 }
 0x2e5   : > { %v1222_v5 = vadd.f32 %v2724_v21, %v1221_v53  ;;  %1752 = vst.msk [vmem:[%s2450_s11 + $0x150] sm:$0xff] %vm1709_vm3, %v1579_v4 }
 0x2e7   : > { %1703 = vst.msk [vmem:[%s2297_s30 + $0x1d0] sm:$0xff] %vm1243_vm2, %v1222_v5  ;;  %2061 = vmatmul.msk.f32.gmra.mxu3 %vm1243_vm2, %v1222_v5 }
 0x2ec   : > { %v1224_v54 = vpop.f32.mrf.mxu3  ;;  %v1582_v55 = vpop.f32.mrf.mxu2 }
 0x2ed   : > { %v1225_v56 = vadd.f32 %v2724_v21, %v1224_v54  ;;  %1753 = vst.msk [vmem:[%s2450_s11 + $0x158] sm:$0xff] %vm1709_vm3, %v1582_v55 }
 0x2ef   : > { %1704 = vst.msk [vmem:[%s2297_s30 + $0x1d8] sm:$0xff] %vm1243_vm2, %v1225_v56  ;;  %2062 = vmatmul.msk.f32.gmra.mxu3 %vm1243_vm2, %v1225_v56 }
 0x2f4   : > { %v1227_v9 = vpop.f32.mrf.mxu3  ;;  %v1585_v57 = vpop.f32.mrf.mxu2 }
 0x2f5   : > { %v1228_v11 = vadd.f32 %v2724_v21, %v1227_v9  ;;  %1754 = vst.msk [vmem:[%s2450_s11 + $0x160] sm:$0xff] %vm1709_vm3, %v1585_v57 }
 0x2f7   : > { %1705 = vst.msk [vmem:[%s2297_s30 + $0x1e0] sm:$0xff] %vm1243_vm2, %v1228_v11  ;;  %2063 = vmatmul.msk.f32.gmra.mxu3 %vm1243_vm2, %v1228_v11 }
 0x2fc   : > { %v1230_v58 = vpop.f32.mrf.mxu3  ;;  %v1588_v59 = vpop.f32.mrf.mxu2 }
 0x2fd   : > { %v1231_v60 = vadd.f32 %v2724_v21, %v1230_v58  ;;  %1755 = vst.msk [vmem:[%s2450_s11 + $0x168] sm:$0xff] %vm1709_vm3, %v1588_v59 }
 0x2ff   : > { %1706 = vst.msk [vmem:[%s2297_s30 + $0x1e8] sm:$0xff] %vm1243_vm2, %v1231_v60  ;;  %2064 = vmatmul.msk.f32.gmra.mxu3 %vm1243_vm2, %v1231_v60 }
 0x304   : > { %v1233_v61 = vpop.f32.mrf.mxu3  ;;  %v1591_v62 = vpop.f32.mrf.mxu2 }
 0x305   : > { %v1234_v63 = vadd.f32 %v2724_v21, %v1233_v61  ;;  %1756 = vst.msk [vmem:[%s2450_s11 + $0x170] sm:$0xff] %vm1709_vm3, %v1591_v62 }
 0x307   : > { %1707 = vst.msk [vmem:[%s2297_s30 + $0x1f0] sm:$0xff] %vm1243_vm2, %v1234_v63  ;;  %2065 = vmatmul.msk.f32.gmra.mxu3 %vm1243_vm2, %v1234_v63 }
 0x30c   : > { %v1236_v0 = vpop.f32.mrf.mxu3  ;;  %v1594_v1 = vpop.f32.mrf.mxu2 }
 0x30d   : > { %v1237_v2 = vadd.f32 %v2724_v21, %v1236_v0  ;;  %1757 = vst.msk [vmem:[%s2450_s11 + $0x178] sm:$0xff] %vm1709_vm3, %v1594_v1 }
 0x30f   : > { %1708 = vst.msk [vmem:[%s2297_s30 + $0x1f8] sm:$0xff] %vm1243_vm2, %v1237_v2  ;;  %2066 = vmatmul.msk.f32.gmra.mxu3 %vm1243_vm2, %v1237_v2 }
 0x31a   : > { %v1597_v3 = vpop.f32.mrf.mxu3 }
 0x31b   : > { %1758 = vst.msk [vmem:[%s2450_s11 + $0x180] sm:$0xff] %vm1709_vm3, %v1597_v3 }
 0x322   : > { %v1600_v6 = vpop.f32.mrf.mxu3 }
 0x323   : > { %1759 = vst.msk [vmem:[%s2450_s11 + $0x188] sm:$0xff] %vm1709_vm3, %v1600_v6 }
 0x32a   : > { %v1603_v7 = vpop.f32.mrf.mxu3 }
 0x32b   : > { %1760 = vst.msk [vmem:[%s2450_s11 + $0x190] sm:$0xff] %vm1709_vm3, %v1603_v7 }
 0x332   : > { %v1606_v8 = vpop.f32.mrf.mxu3 }
 0x333   : > { %1761 = vst.msk [vmem:[%s2450_s11 + $0x198] sm:$0xff] %vm1709_vm3, %v1606_v8 }
 0x33a   : > { %v1609_v10 = vpop.f32.mrf.mxu3 }
 0x33b   : > { %1762 = vst.msk [vmem:[%s2450_s11 + $0x1a0] sm:$0xff] %vm1709_vm3, %v1609_v10 }
 0x342   : > { %v1612_v12 = vpop.f32.mrf.mxu3 }
 0x343   : > { %1763 = vst.msk [vmem:[%s2450_s11 + $0x1a8] sm:$0xff] %vm1709_vm3, %v1612_v12 }
 0x34a   : > { %v1615_v13 = vpop.f32.mrf.mxu3 }
 0x34b   : > { %1764 = vst.msk [vmem:[%s2450_s11 + $0x1b0] sm:$0xff] %vm1709_vm3, %v1615_v13 }
 0x352   : > { %v1618_v14 = vpop.f32.mrf.mxu3 }
 0x353   : > { %1765 = vst.msk [vmem:[%s2450_s11 + $0x1b8] sm:$0xff] %vm1709_vm3, %v1618_v14 }
 0x35a   : > { %v1621_v15 = vpop.f32.mrf.mxu3 }
 0x35b   : > { %1766 = vst.msk [vmem:[%s2450_s11 + $0x1c0] sm:$0xff] %vm1709_vm3, %v1621_v15 }
 0x362   : > { %v1624_v16 = vpop.f32.mrf.mxu3 }
 0x363   : > { %1767 = vst.msk [vmem:[%s2450_s11 + $0x1c8] sm:$0xff] %vm1709_vm3, %v1624_v16 }
 0x36a   : > { %v1627_v17 = vpop.f32.mrf.mxu3 }
 0x36b   : > { %1768 = vst.msk [vmem:[%s2450_s11 + $0x1d0] sm:$0xff] %vm1709_vm3, %v1627_v17 }
 0x372   : > { %v1630_v18 = vpop.f32.mrf.mxu3 }
 0x373   : > { %1769 = vst.msk [vmem:[%s2450_s11 + $0x1d8] sm:$0xff] %vm1709_vm3, %v1630_v18 }
 0x37a   : > { %v1633_v20 = vpop.f32.mrf.mxu3 }
 0x37b   : > { %1770 = vst.msk [vmem:[%s2450_s11 + $0x1e0] sm:$0xff] %vm1709_vm3, %v1633_v20 }
 0x382   : > { %v1636_v21 = vpop.f32.mrf.mxu3 }
 0x383   : > { %1771 = vst.msk [vmem:[%s2450_s11 + $0x1e8] sm:$0xff] %vm1709_vm3, %v1636_v21 }
 0x38a   : > { %v1639_v25 = vpop.f32.mrf.mxu3 }
 0x38b   : > { %1772 = vst.msk [vmem:[%s2450_s11 + $0x1f0] sm:$0xff] %vm1709_vm3, %v1639_v25 }
 0x392   : > { %v1642_v19 = vpop.f32.mrf.mxu3 }
 0x393   : > { %1773 = vst.msk [vmem:[%s2450_s11 + $0x1f8] sm:$0xff] %vm1709_vm3, %v1642_v19 }
 0x394 PF: > { %s18_s24 = sadd.s32 1, %s2094_s24  }
 0x395   : > { %p15_p4 = scmp.ge.s32.totalorder %s18_s24, 4  }
 0x397   :  { %17 = sbr.rel (!%p15_p4) target bundleno = 1 (0x1), region = 86 }

</bundles_post_ra>
